<compile_context>
chip_gen: v7x
topology: tpu7x:2x2x1
jax: 0.10.0
libtpu: 0.0.40
codegen_flags: <defaults>
</compile_context>

<pallas_src>
import functools

import jax
import jax.numpy as jnp
from jax import lax
from jax.experimental import pallas as pl
from jax.experimental.pallas import tpu as pltpu

MM_DTYPE = jnp.bfloat16   # MXU operand dtype; accumulation stays float32


def _lstm_kernel(n_layers, seq_len, batch, hidden_dim,
                 x_ref, h0_ref, c0_ref, w_emb_ref, b_emb_ref, *rest):
    # rest = [w_ih_0 (in,4H), w_hh_0 (H,4H), b_0 (1,4H), ... per layer,
    #         w_fc (H,O), b_fc (1,O),
    #         out_ref (B,1,O), h_n_ref (L,B,H), c_n_ref (L,B,H),
    #         gx_ref (T*B,4H) f32, seq_ref (T*B,H) bf16 (only if L > 1)]
    L, T, B, H = n_layers, seq_len, batch, hidden_dim
    layer_refs = rest[:3 * L]
    w_fc_ref, b_fc_ref = rest[3 * L:3 * L + 2]
    out_ref, h_n_ref, c_n_ref = rest[3 * L + 2:3 * L + 5]
    gx_ref = rest[3 * L + 5]
    seq_ref = rest[3 * L + 6] if L > 1 else None

    # --- embedding Linear + ReLU: one big (T*B, In) @ (In, E) MXU matmul ---
    emb = jnp.dot(x_ref[...].astype(MM_DTYPE), w_emb_ref[...],
                  preferred_element_type=jnp.float32)
    emb = jnp.maximum(emb + b_emb_ref[...], 0.0)          # f32
    layer_in = emb.astype(MM_DTYPE)                       # (T*B, E)

    def cell(gates, c):
        # gates: (B, 4H) f32, PyTorch gate order (i, f, g, o) along lanes.
        sig = jax.nn.sigmoid(gates)            # one EUP pass over all 4H lanes
        i_g = sig[:, 0 * H:1 * H]
        f_g = sig[:, 1 * H:2 * H]
        o_g = sig[:, 3 * H:4 * H]
        g_g = jnp.tanh(gates[:, 2 * H:3 * H])
        c_new = f_g * c + i_g * g_g
        h_new = o_g * jnp.tanh(c_new)
        return h_new, c_new

    h = c = None
    for l in range(L):
        w_ih_ref = layer_refs[3 * l]       # (in_dim, 4H) bf16
        w_hh_ref = layer_refs[3 * l + 1]   # (H, 4H)      bf16
        b_ref = layer_refs[3 * l + 2]      # (1, 4H)      f32 (b_ih + b_hh)

        # Hoisted, gate-fused input projection (bias folded in). One lane-
        # dense whole-ref store -- no reshape relayout, no sublane padding.
        gx_ref[...] = jnp.dot(layer_in, w_ih_ref[...],
                              preferred_element_type=jnp.float32) + b_ref[...]

        h = h0_ref[l]                      # (B, H) f32
        c = c0_ref[l]
        write_seq = l < L - 1              # last layer only needs final h

        if T <= 32:
            # Full static unroll: static row slices of the 2-D scratch.
            for t in range(T):
                gates = gx_ref[pl.ds(t * B, B), :] + jnp.dot(
                    h.astype(MM_DTYPE), w_hh_ref[...],
                    preferred_element_type=jnp.float32)
                h, c = cell(gates, c)
                if write_seq:
                    seq_ref[pl.ds(t * B, B), :] = h.astype(MM_DTYPE)
        else:
            def step(t, carry, write_seq=write_seq, w_hh_ref=w_hh_ref):
                h, c = carry
                off = pl.multiple_of(t * B, B)
                gates = gx_ref[pl.ds(off, B), :] + jnp.dot(
                    h.astype(MM_DTYPE), w_hh_ref[...],
                    preferred_element_type=jnp.float32)
                h_new, c_new = cell(gates, c)
                if write_seq:
                    seq_ref[pl.ds(off, B), :] = h_new.astype(MM_DTYPE)
                return h_new, c_new

            h, c = lax.fori_loop(0, T, step, (h, c), unroll=4)

        h_n_ref[l] = h
        c_n_ref[l] = c

        if write_seq:
            layer_in = seq_ref[...]        # (T*B, H) bf16, next layer's input

    # --- fc + sigmoid on the last time step only (== out[:, -1:, :]) ---
    logits = jnp.dot(h.astype(MM_DTYPE), w_fc_ref[...],
                     preferred_element_type=jnp.float32) + b_fc_ref[...]
    out_ref[...] = jax.nn.sigmoid(logits)[:, None, :]     # (B, 1, O)


def _nbytes(shape, dtype):
    n = 1
    for d in shape:
        n *= int(d)
    return n * jnp.dtype(dtype).itemsize


def lstm_forward(x, hidden, params, *, n_layers, hidden_dim, output_size):
    h0, c0 = hidden
    B, T, In = x.shape
    L, H = n_layers, hidden_dim

    # Time-major, pre-flattened input: the kernel's big matmuls get a dense
    # M = T*B sublane dimension and per-step rows are contiguous blocks.
    x2d = jnp.transpose(x, (1, 0, 2)).reshape(T * B, In)

    inputs = [x2d, h0, c0, params["w_emb"], params["b_emb"]]
    for l in range(L):
        inputs += [params[f"w_ih_{l}"], params[f"w_hh_{l}"], params[f"b_{l}"]]
    inputs += [params["w_fc"], params["b_fc"]]

    out_shapes = (
        jax.ShapeDtypeStruct((B, 1, output_size), jnp.float32),
        jax.ShapeDtypeStruct((L, B, H), jnp.float32),
        jax.ShapeDtypeStruct((L, B, H), jnp.float32),
    )
    scratch = [pltpu.VMEM((T * B, 4 * H), jnp.float32)]
    if L > 1:
        scratch.append(pltpu.VMEM((T * B, H), MM_DTYPE))

    # Raise the scoped-VMEM limit only when the footprint warrants it.
    need = sum(_nbytes(a.shape, a.dtype) for a in inputs)
    need += sum(_nbytes(s.shape, s.dtype) for s in out_shapes)
    need += _nbytes((T * B, 4 * H), jnp.float32)
    if L > 1:
        need += _nbytes((T * B, H), MM_DTYPE)
    compiler_params = None
    if need > (24 << 20):
        compiler_params = pltpu.CompilerParams(
            vmem_limit_bytes=min(int(need * 1.25) + (4 << 20), 100 << 20))

    vmem = pl.BlockSpec(memory_space=pltpu.MemorySpace.VMEM)
    kernel = functools.partial(_lstm_kernel, L, T, B, H)
    out, h_n, c_n = pl.pallas_call(
        kernel,
        out_shape=out_shapes,
        in_specs=[vmem] * len(inputs),
        out_specs=(vmem, vmem, vmem),
        scratch_shapes=scratch,
        compiler_params=compiler_params,
    )(*inputs)
    return out, (h_n, c_n)


def init_params(key, input_size, embedding_dim, hidden_dim, output_size, n_layers):
    """Deterministic synthetic init (PyTorch-style uniform ranges).

    Matmul weights are stored pre-cast to bf16 and pre-transposed / gate-fused
    so the per-call path does no weight casting or relayout:
      w_ih[l]: (in_dim, 4H), w_hh[l]: (H, 4H), b[l]: (1, 4H) == b_ih + b_hh,
    gate order (i, f, g, o) along the 4H axis, matching PyTorch.
    """
    params = {}
    ks = iter(jax.random.split(key, 4 + 4 * n_layers))

    def unif(k, shape, bound):
        return jax.random.uniform(k, shape, jnp.float32, -bound, bound)

    # embedding Linear(input_size, embedding_dim) -- stored transposed (In, E)
    b_e = 1.0 / jnp.sqrt(input_size)
    params["w_emb"] = unif(next(ks), (input_size, embedding_dim), b_e).astype(MM_DTYPE)
    params["b_emb"] = unif(next(ks), (1, embedding_dim), b_e)

    b_h = 1.0 / jnp.sqrt(hidden_dim)
    for l in range(n_layers):
        in_dim = embedding_dim if l == 0 else hidden_dim
        params[f"w_ih_{l}"] = unif(next(ks), (in_dim, 4 * hidden_dim), b_h).astype(MM_DTYPE)
        params[f"w_hh_{l}"] = unif(next(ks), (hidden_dim, 4 * hidden_dim), b_h).astype(MM_DTYPE)
        b_ih = unif(next(ks), (1, 4 * hidden_dim), b_h)
        b_hh = unif(next(ks), (1, 4 * hidden_dim), b_h)
        params[f"b_{l}"] = b_ih + b_hh   # combined bias (numerically identical)

    # fc Linear(hidden_dim, output_size) -- stored transposed (H, O)
    b_f = 1.0 / jnp.sqrt(hidden_dim)
    params["w_fc"] = unif(next(ks), (hidden_dim, output_size), b_f).astype(MM_DTYPE)
    params["b_fc"] = unif(next(ks), (1, output_size), b_f)
    return params


if __name__ == "__main__":
    # Small shapes consistent with the module's forward.
    batch = 2
    seq = 8
    input_size = 16
    embedding_dim = 32
    hidden_dim = 32
    output_size = 4
    n_layers = 2

    key = jax.random.PRNGKey(0)
    k_x, k_p = jax.random.split(key)
    x = jax.random.normal(k_x, (batch, seq, input_size), jnp.float32)

    params = init_params(k_p, input_size, embedding_dim, hidden_dim,
                         output_size, n_layers)

    # init_hidden(batch): zeros
    h0 = jnp.zeros((n_layers, batch, hidden_dim), jnp.float32)
    c0 = jnp.zeros((n_layers, batch, hidden_dim), jnp.float32)

    out, (h_n, c_n) = lstm_forward(
        x, (h0, c0), params,
        n_layers=n_layers, hidden_dim=hidden_dim, output_size=output_size)

    jax.block_until_ready((out, h_n, c_n))
    assert out.shape == (batch, 1, output_size)
    assert h_n.shape == (n_layers, batch, hidden_dim)
    assert c_n.shape == (n_layers, batch, hidden_dim)
    print("KERNEL_OK")
</pallas_src>

<mosaic_0001>
module attributes {stable_mosaic.version = 11 : i64} {
  func.func @_lstm_kernel(%arg0: memref<16x16xf32, #tpu.memory_space<vmem>>, %arg1: memref<2x2x32xf32, #tpu.memory_space<vmem>>, %arg2: memref<2x2x32xf32, #tpu.memory_space<vmem>>, %arg3: memref<16x32xbf16, #tpu.memory_space<vmem>>, %arg4: memref<1x32xf32, #tpu.memory_space<vmem>>, %arg5: memref<32x128xbf16, #tpu.memory_space<vmem>>, %arg6: memref<32x128xbf16, #tpu.memory_space<vmem>>, %arg7: memref<1x128xf32, #tpu.memory_space<vmem>>, %arg8: memref<32x128xbf16, #tpu.memory_space<vmem>>, %arg9: memref<32x128xbf16, #tpu.memory_space<vmem>>, %arg10: memref<1x128xf32, #tpu.memory_space<vmem>>, %arg11: memref<32x4xbf16, #tpu.memory_space<vmem>>, %arg12: memref<1x4xf32, #tpu.memory_space<vmem>>, %arg13: memref<2x1x4xf32, #tpu.memory_space<vmem>>, %arg14: memref<2x2x32xf32, #tpu.memory_space<vmem>>, %arg15: memref<2x2x32xf32, #tpu.memory_space<vmem>>, %arg16: memref<16x128xf32, #tpu.memory_space<vmem>>, %arg17: memref<16x32xbf16, #tpu.memory_space<vmem>>) attributes {dimension_semantics = [], scalar_prefetch = 0 : i64, scratch_operands = 2 : i64, tpu.core_type = #tpu.core_type<tc>} {
    %c0 = arith.constant 0 : index
    %c0_0 = arith.constant 0 : index
    %0 = vector.load %arg0[%c0, %c0_0] : memref<16x16xf32, #tpu.memory_space<vmem>>, vector<16x16xf32>
    %1 = arith.truncf %0 : vector<16x16xf32> to vector<16x16xbf16>
    %c0_1 = arith.constant 0 : index
    %c0_2 = arith.constant 0 : index
    %2 = vector.load %arg3[%c0_1, %c0_2] : memref<16x32xbf16, #tpu.memory_space<vmem>>, vector<16x32xbf16>
    %cst = arith.constant dense<0.000000e+00> : vector<16x32xf32>
    %3 = tpu.matmul %1, %2, %cst {dimension_numbers = #tpu.dot_dimension_numbers<[1], [0], [0], [1], [0, 0, 1, 1], [], []>} : vector<16x16xbf16>, vector<16x32xbf16>, vector<16x32xf32> -> vector<16x32xf32>
    %c0_3 = arith.constant 0 : index
    %c0_4 = arith.constant 0 : index
    %4 = vector.load %arg4[%c0_3, %c0_4] : memref<1x32xf32, #tpu.memory_space<vmem>>, vector<1x32xf32>
    %5 = vector.broadcast %4 : vector<1x32xf32> to vector<16x32xf32>
    %6 = arith.addf %3, %5 : vector<16x32xf32>
    %cst_5 = arith.constant 0.000000e+00 : f32
    %7 = vector.broadcast %cst_5 : f32 to vector<16x32xf32>
    %8 = arith.maximumf %6, %7 : vector<16x32xf32>
    %9 = arith.truncf %8 : vector<16x32xf32> to vector<16x32xbf16>
    %c0_6 = arith.constant 0 : index
    %c0_7 = arith.constant 0 : index
    %10 = vector.load %arg5[%c0_6, %c0_7] : memref<32x128xbf16, #tpu.memory_space<vmem>>, vector<32x128xbf16>
    %cst_8 = arith.constant dense<0.000000e+00> : vector<16x128xf32>
    %11 = tpu.matmul %9, %10, %cst_8 {dimension_numbers = #tpu.dot_dimension_numbers<[1], [0], [0], [1], [0, 0, 1, 1], [], []>} : vector<16x32xbf16>, vector<32x128xbf16>, vector<16x128xf32> -> vector<16x128xf32>
    %c0_9 = arith.constant 0 : index
    %c0_10 = arith.constant 0 : index
    %12 = vector.load %arg7[%c0_9, %c0_10] : memref<1x128xf32, #tpu.memory_space<vmem>>, vector<1x128xf32>
    %13 = vector.broadcast %12 : vector<1x128xf32> to vector<16x128xf32>
    %14 = arith.addf %11, %13 : vector<16x128xf32>
    %c0_11 = arith.constant 0 : index
    %c0_12 = arith.constant 0 : index
    %15 = vector.load %arg16[%c0_11, %c0_12] : memref<16x128xf32, #tpu.memory_space<vmem>>, vector<16x128xf32>
    tpu.vector_store %arg16[%c0_11, %c0_12], %14 {strides = array<i32>} : memref<16x128xf32, #tpu.memory_space<vmem>>, vector<16x128xf32>,
    %c0_13 = arith.constant 0 : index
    %c0_14 = arith.constant 0 : index
    %c0_15 = arith.constant 0 : index
    %16 = vector.load %arg1[%c0_13, %c0_14, %c0_15] : memref<2x2x32xf32, #tpu.memory_space<vmem>>, vector<1x2x32xf32>
    %17 = vector.shape_cast %16 : vector<1x2x32xf32> to vector<2x32xf32>
    %c0_16 = arith.constant 0 : index
    %c0_17 = arith.constant 0 : index
    %c0_18 = arith.constant 0 : index
    %18 = vector.load %arg2[%c0_16, %c0_17, %c0_18] : memref<2x2x32xf32, #tpu.memory_space<vmem>>, vector<1x2x32xf32>
    %19 = vector.shape_cast %18 : vector<1x2x32xf32> to vector<2x32xf32>
    %c0_19 = arith.constant 0 : index
    %c0_20 = arith.constant 0 : index
    %20 = vector.load %arg16[%c0_19, %c0_20] : memref<16x128xf32, #tpu.memory_space<vmem>>, vector<2x128xf32>
    %21 = arith.truncf %17 : vector<2x32xf32> to vector<2x32xbf16>
    %c0_21 = arith.constant 0 : index
    %c0_22 = arith.constant 0 : index
    %22 = vector.load %arg6[%c0_21, %c0_22] : memref<32x128xbf16, #tpu.memory_space<vmem>>, vector<32x128xbf16>
    %cst_23 = arith.constant dense<0.000000e+00> : vector<2x128xf32>
    %23 = tpu.matmul %21, %22, %cst_23 {dimension_numbers = #tpu.dot_dimension_numbers<[1], [0], [0], [1], [0, 0, 1, 1], [], []>} : vector<2x32xbf16>, vector<32x128xbf16>, vector<2x128xf32> -> vector<2x128xf32>
    %24 = arith.addf %20, %23 : vector<2x128xf32>
    %25 = arith.negf %24 : vector<2x128xf32>
    %26 = math.exp %25 : vector<2x128xf32>
    %cst_24 = arith.constant 1.000000e+00 : f32
    %27 = vector.broadcast %cst_24 : f32 to vector<2x128xf32>
    %28 = arith.addf %27, %26 : vector<2x128xf32>
    %29 = arith.divf %27, %28 : vector<2x128xf32>
    %30 = vector.extract_strided_slice %29 {offsets = [0, 0], sizes = [2, 32], strides = [1, 1]} : vector<2x128xf32> to vector<2x32xf32>
    %31 = vector.extract_strided_slice %29 {offsets = [0, 32], sizes = [2, 32], strides = [1, 1]} : vector<2x128xf32> to vector<2x32xf32>
    %32 = vector.extract_strided_slice %29 {offsets = [0, 96], sizes = [2, 32], strides = [1, 1]} : vector<2x128xf32> to vector<2x32xf32>
    %33 = vector.extract_strided_slice %24 {offsets = [0, 64], sizes = [2, 32], strides = [1, 1]} : vector<2x128xf32> to vector<2x32xf32>
    %34 = math.tanh %33 : vector<2x32xf32>
    %35 = arith.mulf %31, %19 : vector<2x32xf32>
    %36 = arith.mulf %30, %34 : vector<2x32xf32>
    %37 = arith.addf %35, %36 : vector<2x32xf32>
    %38 = math.tanh %37 : vector<2x32xf32>
    %39 = arith.mulf %32, %38 : vector<2x32xf32>
    %40 = arith.truncf %39 : vector<2x32xf32> to vector<2x32xbf16>
    %c0_25 = arith.constant 0 : index
    %c0_26 = arith.constant 0 : index
    %41 = vector.load %arg17[%c0_25, %c0_26] : memref<16x32xbf16, #tpu.memory_space<vmem>>, vector<2x32xbf16>
    tpu.vector_store %arg17[%c0_25, %c0_26], %40 {strides = array<i32>} : memref<16x32xbf16, #tpu.memory_space<vmem>>, vector<2x32xbf16>,
    %c2 = arith.constant 2 : index
    %c0_27 = arith.constant 0 : index
    %42 = vector.load %arg16[%c2, %c0_27] : memref<16x128xf32, #tpu.memory_space<vmem>>, vector<2x128xf32>
    %43 = arith.truncf %39 : vector<2x32xf32> to vector<2x32xbf16>
    %c0_28 = arith.constant 0 : index
    %c0_29 = arith.constant 0 : index
    %44 = vector.load %arg6[%c0_28, %c0_29] : memref<32x128xbf16, #tpu.memory_space<vmem>>, vector<32x128xbf16>
    %cst_30 = arith.constant dense<0.000000e+00> : vector<2x128xf32>
    %45 = tpu.matmul %43, %44, %cst_30 {dimension_numbers = #tpu.dot_dimension_numbers<[1], [0], [0], [1], [0, 0, 1, 1], [], []>} : vector<2x32xbf16>, vector<32x128xbf16>, vector<2x128xf32> -> vector<2x128xf32>
    %46 = arith.addf %42, %45 : vector<2x128xf32>
    %47 = arith.negf %46 : vector<2x128xf32>
    %48 = math.exp %47 : vector<2x128xf32>
    %cst_31 = arith.constant 1.000000e+00 : f32
    %49 = vector.broadcast %cst_31 : f32 to vector<2x128xf32>
    %50 = arith.addf %49, %48 : vector<2x128xf32>
    %51 = arith.divf %49, %50 : vector<2x128xf32>
    %52 = vector.extract_strided_slice %51 {offsets = [0, 0], sizes = [2, 32], strides = [1, 1]} : vector<2x128xf32> to vector<2x32xf32>
    %53 = vector.extract_strided_slice %51 {offsets = [0, 32], sizes = [2, 32], strides = [1, 1]} : vector<2x128xf32> to vector<2x32xf32>
    %54 = vector.extract_strided_slice %51 {offsets = [0, 96], sizes = [2, 32], strides = [1, 1]} : vector<2x128xf32> to vector<2x32xf32>
    %55 = vector.extract_strided_slice %46 {offsets = [0, 64], sizes = [2, 32], strides = [1, 1]} : vector<2x128xf32> to vector<2x32xf32>
    %56 = math.tanh %55 : vector<2x32xf32>
    %57 = arith.mulf %53, %37 : vector<2x32xf32>
    %58 = arith.mulf %52, %56 : vector<2x32xf32>
    %59 = arith.addf %57, %58 : vector<2x32xf32>
    %60 = math.tanh %59 : vector<2x32xf32>
    %61 = arith.mulf %54, %60 : vector<2x32xf32>
    %62 = arith.truncf %61 : vector<2x32xf32> to vector<2x32xbf16>
    %c2_32 = arith.constant 2 : index
    %c0_33 = arith.constant 0 : index
    %63 = vector.load %arg17[%c2_32, %c0_33] : memref<16x32xbf16, #tpu.memory_space<vmem>>, vector<2x32xbf16>
    tpu.vector_store %arg17[%c2_32, %c0_33], %62 {strides = array<i32>} : memref<16x32xbf16, #tpu.memory_space<vmem>>, vector<2x32xbf16>,
    %c4 = arith.constant 4 : index
    %c0_34 = arith.constant 0 : index
    %64 = vector.load %arg16[%c4, %c0_34] : memref<16x128xf32, #tpu.memory_space<vmem>>, vector<2x128xf32>
    %65 = arith.truncf %61 : vector<2x32xf32> to vector<2x32xbf16>
    %c0_35 = arith.constant 0 : index
    %c0_36 = arith.constant 0 : index
    %66 = vector.load %arg6[%c0_35, %c0_36] : memref<32x128xbf16, #tpu.memory_space<vmem>>, vector<32x128xbf16>
    %cst_37 = arith.constant dense<0.000000e+00> : vector<2x128xf32>
    %67 = tpu.matmul %65, %66, %cst_37 {dimension_numbers = #tpu.dot_dimension_numbers<[1], [0], [0], [1], [0, 0, 1, 1], [], []>} : vector<2x32xbf16>, vector<32x128xbf16>, vector<2x128xf32> -> vector<2x128xf32>
    %68 = arith.addf %64, %67 : vector<2x128xf32>
    %69 = arith.negf %68 : vector<2x128xf32>
    %70 = math.exp %69 : vector<2x128xf32>
    %cst_38 = arith.constant 1.000000e+00 : f32
    %71 = vector.broadcast %cst_38 : f32 to vector<2x128xf32>
    %72 = arith.addf %71, %70 : vector<2x128xf32>
    %73 = arith.divf %71, %72 : vector<2x128xf32>
    %74 = vector.extract_strided_slice %73 {offsets = [0, 0], sizes = [2, 32], strides = [1, 1]} : vector<2x128xf32> to vector<2x32xf32>
    %75 = vector.extract_strided_slice %73 {offsets = [0, 32], sizes = [2, 32], strides = [1, 1]} : vector<2x128xf32> to vector<2x32xf32>
    %76 = vector.extract_strided_slice %73 {offsets = [0, 96], sizes = [2, 32], strides = [1, 1]} : vector<2x128xf32> to vector<2x32xf32>
    %77 = vector.extract_strided_slice %68 {offsets = [0, 64], sizes = [2, 32], strides = [1, 1]} : vector<2x128xf32> to vector<2x32xf32>
    %78 = math.tanh %77 : vector<2x32xf32>
    %79 = arith.mulf %75, %59 : vector<2x32xf32>
    %80 = arith.mulf %74, %78 : vector<2x32xf32>
    %81 = arith.addf %79, %80 : vector<2x32xf32>
    %82 = math.tanh %81 : vector<2x32xf32>
    %83 = arith.mulf %76, %82 : vector<2x32xf32>
    %84 = arith.truncf %83 : vector<2x32xf32> to vector<2x32xbf16>
    %c4_39 = arith.constant 4 : index
    %c0_40 = arith.constant 0 : index
    %85 = vector.load %arg17[%c4_39, %c0_40] : memref<16x32xbf16, #tpu.memory_space<vmem>>, vector<2x32xbf16>
    tpu.vector_store %arg17[%c4_39, %c0_40], %84 {strides = array<i32>} : memref<16x32xbf16, #tpu.memory_space<vmem>>, vector<2x32xbf16>,
    %c6 = arith.constant 6 : index
    %c0_41 = arith.constant 0 : index
    %86 = vector.load %arg16[%c6, %c0_41] : memref<16x128xf32, #tpu.memory_space<vmem>>, vector<2x128xf32>
    %87 = arith.truncf %83 : vector<2x32xf32> to vector<2x32xbf16>
    %c0_42 = arith.constant 0 : index
    %c0_43 = arith.constant 0 : index
    %88 = vector.load %arg6[%c0_42, %c0_43] : memref<32x128xbf16, #tpu.memory_space<vmem>>, vector<32x128xbf16>
    %cst_44 = arith.constant dense<0.000000e+00> : vector<2x128xf32>
    %89 = tpu.matmul %87, %88, %cst_44 {dimension_numbers = #tpu.dot_dimension_numbers<[1], [0], [0], [1], [0, 0, 1, 1], [], []>} : vector<2x32xbf16>, vector<32x128xbf16>, vector<2x128xf32> -> vector<2x128xf32>
    %90 = arith.addf %86, %89 : vector<2x128xf32>
    %91 = arith.negf %90 : vector<2x128xf32>
    %92 = math.exp %91 : vector<2x128xf32>
    %cst_45 = arith.constant 1.000000e+00 : f32
    %93 = vector.broadcast %cst_45 : f32 to vector<2x128xf32>
    %94 = arith.addf %93, %92 : vector<2x128xf32>
    %95 = arith.divf %93, %94 : vector<2x128xf32>
    %96 = vector.extract_strided_slice %95 {offsets = [0, 0], sizes = [2, 32], strides = [1, 1]} : vector<2x128xf32> to vector<2x32xf32>
    %97 = vector.extract_strided_slice %95 {offsets = [0, 32], sizes = [2, 32], strides = [1, 1]} : vector<2x128xf32> to vector<2x32xf32>
    %98 = vector.extract_strided_slice %95 {offsets = [0, 96], sizes = [2, 32], strides = [1, 1]} : vector<2x128xf32> to vector<2x32xf32>
    %99 = vector.extract_strided_slice %90 {offsets = [0, 64], sizes = [2, 32], strides = [1, 1]} : vector<2x128xf32> to vector<2x32xf32>
    %100 = math.tanh %99 : vector<2x32xf32>
    %101 = arith.mulf %97, %81 : vector<2x32xf32>
    %102 = arith.mulf %96, %100 : vector<2x32xf32>
    %103 = arith.addf %101, %102 : vector<2x32xf32>
    %104 = math.tanh %103 : vector<2x32xf32>
    %105 = arith.mulf %98, %104 : vector<2x32xf32>
    %106 = arith.truncf %105 : vector<2x32xf32> to vector<2x32xbf16>
    %c6_46 = arith.constant 6 : index
    %c0_47 = arith.constant 0 : index
    %107 = vector.load %arg17[%c6_46, %c0_47] : memref<16x32xbf16, #tpu.memory_space<vmem>>, vector<2x32xbf16>
    tpu.vector_store %arg17[%c6_46, %c0_47], %106 {strides = array<i32>} : memref<16x32xbf16, #tpu.memory_space<vmem>>, vector<2x32xbf16>,
    %c8 = arith.constant 8 : index
    %c0_48 = arith.constant 0 : index
    %108 = vector.load %arg16[%c8, %c0_48] : memref<16x128xf32, #tpu.memory_space<vmem>>, vector<2x128xf32>
    %109 = arith.truncf %105 : vector<2x32xf32> to vector<2x32xbf16>
    %c0_49 = arith.constant 0 : index
    %c0_50 = arith.constant 0 : index
    %110 = vector.load %arg6[%c0_49, %c0_50] : memref<32x128xbf16, #tpu.memory_space<vmem>>, vector<32x128xbf16>
    %cst_51 = arith.constant dense<0.000000e+00> : vector<2x128xf32>
    %111 = tpu.matmul %109, %110, %cst_51 {dimension_numbers = #tpu.dot_dimension_numbers<[1], [0], [0], [1], [0, 0, 1, 1], [], []>} : vector<2x32xbf16>, vector<32x128xbf16>, vector<2x128xf32> -> vector<2x128xf32>
    %112 = arith.addf %108, %111 : vector<2x128xf32>
    %113 = arith.negf %112 : vector<2x128xf32>
    %114 = math.exp %113 : vector<2x128xf32>
    %cst_52 = arith.constant 1.000000e+00 : f32
    %115 = vector.broadcast %cst_52 : f32 to vector<2x128xf32>
    %116 = arith.addf %115, %114 : vector<2x128xf32>
    %117 = arith.divf %115, %116 : vector<2x128xf32>
    %118 = vector.extract_strided_slice %117 {offsets = [0, 0], sizes = [2, 32], strides = [1, 1]} : vector<2x128xf32> to vector<2x32xf32>
    %119 = vector.extract_strided_slice %117 {offsets = [0, 32], sizes = [2, 32], strides = [1, 1]} : vector<2x128xf32> to vector<2x32xf32>
    %120 = vector.extract_strided_slice %117 {offsets = [0, 96], sizes = [2, 32], strides = [1, 1]} : vector<2x128xf32> to vector<2x32xf32>
    %121 = vector.extract_strided_slice %112 {offsets = [0, 64], sizes = [2, 32], strides = [1, 1]} : vector<2x128xf32> to vector<2x32xf32>
    %122 = math.tanh %121 : vector<2x32xf32>
    %123 = arith.mulf %119, %103 : vector<2x32xf32>
    %124 = arith.mulf %118, %122 : vector<2x32xf32>
    %125 = arith.addf %123, %124 : vector<2x32xf32>
    %126 = math.tanh %125 : vector<2x32xf32>
    %127 = arith.mulf %120, %126 : vector<2x32xf32>
    %128 = arith.truncf %127 : vector<2x32xf32> to vector<2x32xbf16>
    %c8_53 = arith.constant 8 : index
    %c0_54 = arith.constant 0 : index
    %129 = vector.load %arg17[%c8_53, %c0_54] : memref<16x32xbf16, #tpu.memory_space<vmem>>, vector<2x32xbf16>
    tpu.vector_store %arg17[%c8_53, %c0_54], %128 {strides = array<i32>} : memref<16x32xbf16, #tpu.memory_space<vmem>>, vector<2x32xbf16>,
    %c10 = arith.constant 10 : index
    %c0_55 = arith.constant 0 : index
    %130 = vector.load %arg16[%c10, %c0_55] : memref<16x128xf32, #tpu.memory_space<vmem>>, vector<2x128xf32>
    %131 = arith.truncf %127 : vector<2x32xf32> to vector<2x32xbf16>
    %c0_56 = arith.constant 0 : index
    %c0_57 = arith.constant 0 : index
    %132 = vector.load %arg6[%c0_56, %c0_57] : memref<32x128xbf16, #tpu.memory_space<vmem>>, vector<32x128xbf16>
    %cst_58 = arith.constant dense<0.000000e+00> : vector<2x128xf32>
    %133 = tpu.matmul %131, %132, %cst_58 {dimension_numbers = #tpu.dot_dimension_numbers<[1], [0], [0], [1], [0, 0, 1, 1], [], []>} : vector<2x32xbf16>, vector<32x128xbf16>, vector<2x128xf32> -> vector<2x128xf32>
    %134 = arith.addf %130, %133 : vector<2x128xf32>
    %135 = arith.negf %134 : vector<2x128xf32>
    %136 = math.exp %135 : vector<2x128xf32>
    %cst_59 = arith.constant 1.000000e+00 : f32
    %137 = vector.broadcast %cst_59 : f32 to vector<2x128xf32>
    %138 = arith.addf %137, %136 : vector<2x128xf32>
    %139 = arith.divf %137, %138 : vector<2x128xf32>
    %140 = vector.extract_strided_slice %139 {offsets = [0, 0], sizes = [2, 32], strides = [1, 1]} : vector<2x128xf32> to vector<2x32xf32>
    %141 = vector.extract_strided_slice %139 {offsets = [0, 32], sizes = [2, 32], strides = [1, 1]} : vector<2x128xf32> to vector<2x32xf32>
    %142 = vector.extract_strided_slice %139 {offsets = [0, 96], sizes = [2, 32], strides = [1, 1]} : vector<2x128xf32> to vector<2x32xf32>
    %143 = vector.extract_strided_slice %134 {offsets = [0, 64], sizes = [2, 32], strides = [1, 1]} : vector<2x128xf32> to vector<2x32xf32>
    %144 = math.tanh %143 : vector<2x32xf32>
    %145 = arith.mulf %141, %125 : vector<2x32xf32>
    %146 = arith.mulf %140, %144 : vector<2x32xf32>
    %147 = arith.addf %145, %146 : vector<2x32xf32>
    %148 = math.tanh %147 : vector<2x32xf32>
    %149 = arith.mulf %142, %148 : vector<2x32xf32>
    %150 = arith.truncf %149 : vector<2x32xf32> to vector<2x32xbf16>
    %c10_60 = arith.constant 10 : index
    %c0_61 = arith.constant 0 : index
    %151 = vector.load %arg17[%c10_60, %c0_61] : memref<16x32xbf16, #tpu.memory_space<vmem>>, vector<2x32xbf16>
    tpu.vector_store %arg17[%c10_60, %c0_61], %150 {strides = array<i32>} : memref<16x32xbf16, #tpu.memory_space<vmem>>, vector<2x32xbf16>,
    %c12 = arith.constant 12 : index
    %c0_62 = arith.constant 0 : index
    %152 = vector.load %arg16[%c12, %c0_62] : memref<16x128xf32, #tpu.memory_space<vmem>>, vector<2x128xf32>
    %153 = arith.truncf %149 : vector<2x32xf32> to vector<2x32xbf16>
    %c0_63 = arith.constant 0 : index
    %c0_64 = arith.constant 0 : index
    %154 = vector.load %arg6[%c0_63, %c0_64] : memref<32x128xbf16, #tpu.memory_space<vmem>>, vector<32x128xbf16>
    %cst_65 = arith.constant dense<0.000000e+00> : vector<2x128xf32>
    %155 = tpu.matmul %153, %154, %cst_65 {dimension_numbers = #tpu.dot_dimension_numbers<[1], [0], [0], [1], [0, 0, 1, 1], [], []>} : vector<2x32xbf16>, vector<32x128xbf16>, vector<2x128xf32> -> vector<2x128xf32>
    %156 = arith.addf %152, %155 : vector<2x128xf32>
    %157 = arith.negf %156 : vector<2x128xf32>
    %158 = math.exp %157 : vector<2x128xf32>
    %cst_66 = arith.constant 1.000000e+00 : f32
    %159 = vector.broadcast %cst_66 : f32 to vector<2x128xf32>
    %160 = arith.addf %159, %158 : vector<2x128xf32>
    %161 = arith.divf %159, %160 : vector<2x128xf32>
    %162 = vector.extract_strided_slice %161 {offsets = [0, 0], sizes = [2, 32], strides = [1, 1]} : vector<2x128xf32> to vector<2x32xf32>
    %163 = vector.extract_strided_slice %161 {offsets = [0, 32], sizes = [2, 32], strides = [1, 1]} : vector<2x128xf32> to vector<2x32xf32>
    %164 = vector.extract_strided_slice %161 {offsets = [0, 96], sizes = [2, 32], strides = [1, 1]} : vector<2x128xf32> to vector<2x32xf32>
    %165 = vector.extract_strided_slice %156 {offsets = [0, 64], sizes = [2, 32], strides = [1, 1]} : vector<2x128xf32> to vector<2x32xf32>
    %166 = math.tanh %165 : vector<2x32xf32>
    %167 = arith.mulf %163, %147 : vector<2x32xf32>
    %168 = arith.mulf %162, %166 : vector<2x32xf32>
    %169 = arith.addf %167, %168 : vector<2x32xf32>
    %170 = math.tanh %169 : vector<2x32xf32>
    %171 = arith.mulf %164, %170 : vector<2x32xf32>
    %172 = arith.truncf %171 : vector<2x32xf32> to vector<2x32xbf16>
    %c12_67 = arith.constant 12 : index
    %c0_68 = arith.constant 0 : index
    %173 = vector.load %arg17[%c12_67, %c0_68] : memref<16x32xbf16, #tpu.memory_space<vmem>>, vector<2x32xbf16>
    tpu.vector_store %arg17[%c12_67, %c0_68], %172 {strides = array<i32>} : memref<16x32xbf16, #tpu.memory_space<vmem>>, vector<2x32xbf16>,
    %c14 = arith.constant 14 : index
    %c0_69 = arith.constant 0 : index
    %174 = vector.load %arg16[%c14, %c0_69] : memref<16x128xf32, #tpu.memory_space<vmem>>, vector<2x128xf32>
    %175 = arith.truncf %171 : vector<2x32xf32> to vector<2x32xbf16>
    %c0_70 = arith.constant 0 : index
    %c0_71 = arith.constant 0 : index
    %176 = vector.load %arg6[%c0_70, %c0_71] : memref<32x128xbf16, #tpu.memory_space<vmem>>, vector<32x128xbf16>
    %cst_72 = arith.constant dense<0.000000e+00> : vector<2x128xf32>
    %177 = tpu.matmul %175, %176, %cst_72 {dimension_numbers = #tpu.dot_dimension_numbers<[1], [0], [0], [1], [0, 0, 1, 1], [], []>} : vector<2x32xbf16>, vector<32x128xbf16>, vector<2x128xf32> -> vector<2x128xf32>
    %178 = arith.addf %174, %177 : vector<2x128xf32>
    %179 = arith.negf %178 : vector<2x128xf32>
    %180 = math.exp %179 : vector<2x128xf32>
    %cst_73 = arith.constant 1.000000e+00 : f32
    %181 = vector.broadcast %cst_73 : f32 to vector<2x128xf32>
    %182 = arith.addf %181, %180 : vector<2x128xf32>
    %183 = arith.divf %181, %182 : vector<2x128xf32>
    %184 = vector.extract_strided_slice %183 {offsets = [0, 0], sizes = [2, 32], strides = [1, 1]} : vector<2x128xf32> to vector<2x32xf32>
    %185 = vector.extract_strided_slice %183 {offsets = [0, 32], sizes = [2, 32], strides = [1, 1]} : vector<2x128xf32> to vector<2x32xf32>
    %186 = vector.extract_strided_slice %183 {offsets = [0, 96], sizes = [2, 32], strides = [1, 1]} : vector<2x128xf32> to vector<2x32xf32>
    %187 = vector.extract_strided_slice %178 {offsets = [0, 64], sizes = [2, 32], strides = [1, 1]} : vector<2x128xf32> to vector<2x32xf32>
    %188 = math.tanh %187 : vector<2x32xf32>
    %189 = arith.mulf %185, %169 : vector<2x32xf32>
    %190 = arith.mulf %184, %188 : vector<2x32xf32>
    %191 = arith.addf %189, %190 : vector<2x32xf32>
    %192 = math.tanh %191 : vector<2x32xf32>
    %193 = arith.mulf %186, %192 : vector<2x32xf32>
    %194 = arith.truncf %193 : vector<2x32xf32> to vector<2x32xbf16>
    %c14_74 = arith.constant 14 : index
    %c0_75 = arith.constant 0 : index
    %195 = vector.load %arg17[%c14_74, %c0_75] : memref<16x32xbf16, #tpu.memory_space<vmem>>, vector<2x32xbf16>
    tpu.vector_store %arg17[%c14_74, %c0_75], %194 {strides = array<i32>} : memref<16x32xbf16, #tpu.memory_space<vmem>>, vector<2x32xbf16>,
    %c0_76 = arith.constant 0 : index
    %c0_77 = arith.constant 0 : index
    %c0_78 = arith.constant 0 : index
    %196 = vector.load %arg14[%c0_76, %c0_77, %c0_78] : memref<2x2x32xf32, #tpu.memory_space<vmem>>, vector<1x2x32xf32>
    %197 = vector.shape_cast %196 : vector<1x2x32xf32> to vector<2x32xf32>
    %198 = vector.shape_cast %193 : vector<2x32xf32> to vector<1x2x32xf32>
    tpu.vector_store %arg14[%c0_76, %c0_77, %c0_78], %198 {strides = array<i32>} : memref<2x2x32xf32, #tpu.memory_space<vmem>>, vector<1x2x32xf32>,
    %c0_79 = arith.constant 0 : index
    %c0_80 = arith.constant 0 : index
    %c0_81 = arith.constant 0 : index
    %199 = vector.load %arg15[%c0_79, %c0_80, %c0_81] : memref<2x2x32xf32, #tpu.memory_space<vmem>>, vector<1x2x32xf32>
    %200 = vector.shape_cast %199 : vector<1x2x32xf32> to vector<2x32xf32>
    %201 = vector.shape_cast %191 : vector<2x32xf32> to vector<1x2x32xf32>
    tpu.vector_store %arg15[%c0_79, %c0_80, %c0_81], %201 {strides = array<i32>} : memref<2x2x32xf32, #tpu.memory_space<vmem>>, vector<1x2x32xf32>,
    %c0_82 = arith.constant 0 : index
    %c0_83 = arith.constant 0 : index
    %202 = vector.load %arg17[%c0_82, %c0_83] : memref<16x32xbf16, #tpu.memory_space<vmem>>, vector<16x32xbf16>
    %c0_84 = arith.constant 0 : index
    %c0_85 = arith.constant 0 : index
    %203 = vector.load %arg8[%c0_84, %c0_85] : memref<32x128xbf16, #tpu.memory_space<vmem>>, vector<32x128xbf16>
    %cst_86 = arith.constant dense<0.000000e+00> : vector<16x128xf32>
    %204 = tpu.matmul %202, %203, %cst_86 {dimension_numbers = #tpu.dot_dimension_numbers<[1], [0], [0], [1], [0, 0, 1, 1], [], []>} : vector<16x32xbf16>, vector<32x128xbf16>, vector<16x128xf32> -> vector<16x128xf32>
    %c0_87 = arith.constant 0 : index
    %c0_88 = arith.constant 0 : index
    %205 = vector.load %arg10[%c0_87, %c0_88] : memref<1x128xf32, #tpu.memory_space<vmem>>, vector<1x128xf32>
    %206 = vector.broadcast %205 : vector<1x128xf32> to vector<16x128xf32>
    %207 = arith.addf %204, %206 : vector<16x128xf32>
    %c0_89 = arith.constant 0 : index
    %c0_90 = arith.constant 0 : index
    %208 = vector.load %arg16[%c0_89, %c0_90] : memref<16x128xf32, #tpu.memory_space<vmem>>, vector<16x128xf32>
    tpu.vector_store %arg16[%c0_89, %c0_90], %207 {strides = array<i32>} : memref<16x128xf32, #tpu.memory_space<vmem>>, vector<16x128xf32>,
    %c1 = arith.constant 1 : index
    %c0_91 = arith.constant 0 : index
    %c0_92 = arith.constant 0 : index
    %209 = vector.load %arg1[%c1, %c0_91, %c0_92] : memref<2x2x32xf32, #tpu.memory_space<vmem>>, vector<1x2x32xf32>
    %210 = vector.shape_cast %209 : vector<1x2x32xf32> to vector<2x32xf32>
    %c1_93 = arith.constant 1 : index
    %c0_94 = arith.constant 0 : index
    %c0_95 = arith.constant 0 : index
    %211 = vector.load %arg2[%c1_93, %c0_94, %c0_95] : memref<2x2x32xf32, #tpu.memory_space<vmem>>, vector<1x2x32xf32>
    %212 = vector.shape_cast %211 : vector<1x2x32xf32> to vector<2x32xf32>
    %c0_96 = arith.constant 0 : index
    %c0_97 = arith.constant 0 : index
    %213 = vector.load %arg16[%c0_96, %c0_97] : memref<16x128xf32, #tpu.memory_space<vmem>>, vector<2x128xf32>
    %214 = arith.truncf %210 : vector<2x32xf32> to vector<2x32xbf16>
    %c0_98 = arith.constant 0 : index
    %c0_99 = arith.constant 0 : index
    %215 = vector.load %arg9[%c0_98, %c0_99] : memref<32x128xbf16, #tpu.memory_space<vmem>>, vector<32x128xbf16>
    %cst_100 = arith.constant dense<0.000000e+00> : vector<2x128xf32>
    %216 = tpu.matmul %214, %215, %cst_100 {dimension_numbers = #tpu.dot_dimension_numbers<[1], [0], [0], [1], [0, 0, 1, 1], [], []>} : vector<2x32xbf16>, vector<32x128xbf16>, vector<2x128xf32> -> vector<2x128xf32>
    %217 = arith.addf %213, %216 : vector<2x128xf32>
    %218 = arith.negf %217 : vector<2x128xf32>
    %219 = math.exp %218 : vector<2x128xf32>
    %cst_101 = arith.constant 1.000000e+00 : f32
    %220 = vector.broadcast %cst_101 : f32 to vector<2x128xf32>
    %221 = arith.addf %220, %219 : vector<2x128xf32>
    %222 = arith.divf %220, %221 : vector<2x128xf32>
    %223 = vector.extract_strided_slice %222 {offsets = [0, 0], sizes = [2, 32], strides = [1, 1]} : vector<2x128xf32> to vector<2x32xf32>
    %224 = vector.extract_strided_slice %222 {offsets = [0, 32], sizes = [2, 32], strides = [1, 1]} : vector<2x128xf32> to vector<2x32xf32>
    %225 = vector.extract_strided_slice %222 {offsets = [0, 96], sizes = [2, 32], strides = [1, 1]} : vector<2x128xf32> to vector<2x32xf32>
    %226 = vector.extract_strided_slice %217 {offsets = [0, 64], sizes = [2, 32], strides = [1, 1]} : vector<2x128xf32> to vector<2x32xf32>
    %227 = math.tanh %226 : vector<2x32xf32>
    %228 = arith.mulf %224, %212 : vector<2x32xf32>
    %229 = arith.mulf %223, %227 : vector<2x32xf32>
    %230 = arith.addf %228, %229 : vector<2x32xf32>
    %231 = math.tanh %230 : vector<2x32xf32>
    %232 = arith.mulf %225, %231 : vector<2x32xf32>
    %c2_102 = arith.constant 2 : index
    %c0_103 = arith.constant 0 : index
    %233 = vector.load %arg16[%c2_102, %c0_103] : memref<16x128xf32, #tpu.memory_space<vmem>>, vector<2x128xf32>
    %234 = arith.truncf %232 : vector<2x32xf32> to vector<2x32xbf16>
    %c0_104 = arith.constant 0 : index
    %c0_105 = arith.constant 0 : index
    %235 = vector.load %arg9[%c0_104, %c0_105] : memref<32x128xbf16, #tpu.memory_space<vmem>>, vector<32x128xbf16>
    %cst_106 = arith.constant dense<0.000000e+00> : vector<2x128xf32>
    %236 = tpu.matmul %234, %235, %cst_106 {dimension_numbers = #tpu.dot_dimension_numbers<[1], [0], [0], [1], [0, 0, 1, 1], [], []>} : vector<2x32xbf16>, vector<32x128xbf16>, vector<2x128xf32> -> vector<2x128xf32>
    %237 = arith.addf %233, %236 : vector<2x128xf32>
    %238 = arith.negf %237 : vector<2x128xf32>
    %239 = math.exp %238 : vector<2x128xf32>
    %cst_107 = arith.constant 1.000000e+00 : f32
    %240 = vector.broadcast %cst_107 : f32 to vector<2x128xf32>
    %241 = arith.addf %240, %239 : vector<2x128xf32>
    %242 = arith.divf %240, %241 : vector<2x128xf32>
    %243 = vector.extract_strided_slice %242 {offsets = [0, 0], sizes = [2, 32], strides = [1, 1]} : vector<2x128xf32> to vector<2x32xf32>
    %244 = vector.extract_strided_slice %242 {offsets = [0, 32], sizes = [2, 32], strides = [1, 1]} : vector<2x128xf32> to vector<2x32xf32>
    %245 = vector.extract_strided_slice %242 {offsets = [0, 96], sizes = [2, 32], strides = [1, 1]} : vector<2x128xf32> to vector<2x32xf32>
    %246 = vector.extract_strided_slice %237 {offsets = [0, 64], sizes = [2, 32], strides = [1, 1]} : vector<2x128xf32> to vector<2x32xf32>
    %247 = math.tanh %246 : vector<2x32xf32>
    %248 = arith.mulf %244, %230 : vector<2x32xf32>
    %249 = arith.mulf %243, %247 : vector<2x32xf32>
    %250 = arith.addf %248, %249 : vector<2x32xf32>
    %251 = math.tanh %250 : vector<2x32xf32>
    %252 = arith.mulf %245, %251 : vector<2x32xf32>
    %c4_108 = arith.constant 4 : index
    %c0_109 = arith.constant 0 : index
    %253 = vector.load %arg16[%c4_108, %c0_109] : memref<16x128xf32, #tpu.memory_space<vmem>>, vector<2x128xf32>
    %254 = arith.truncf %252 : vector<2x32xf32> to vector<2x32xbf16>
    %c0_110 = arith.constant 0 : index
    %c0_111 = arith.constant 0 : index
    %255 = vector.load %arg9[%c0_110, %c0_111] : memref<32x128xbf16, #tpu.memory_space<vmem>>, vector<32x128xbf16>
    %cst_112 = arith.constant dense<0.000000e+00> : vector<2x128xf32>
    %256 = tpu.matmul %254, %255, %cst_112 {dimension_numbers = #tpu.dot_dimension_numbers<[1], [0], [0], [1], [0, 0, 1, 1], [], []>} : vector<2x32xbf16>, vector<32x128xbf16>, vector<2x128xf32> -> vector<2x128xf32>
    %257 = arith.addf %253, %256 : vector<2x128xf32>
    %258 = arith.negf %257 : vector<2x128xf32>
    %259 = math.exp %258 : vector<2x128xf32>
    %cst_113 = arith.constant 1.000000e+00 : f32
    %260 = vector.broadcast %cst_113 : f32 to vector<2x128xf32>
    %261 = arith.addf %260, %259 : vector<2x128xf32>
    %262 = arith.divf %260, %261 : vector<2x128xf32>
    %263 = vector.extract_strided_slice %262 {offsets = [0, 0], sizes = [2, 32], strides = [1, 1]} : vector<2x128xf32> to vector<2x32xf32>
    %264 = vector.extract_strided_slice %262 {offsets = [0, 32], sizes = [2, 32], strides = [1, 1]} : vector<2x128xf32> to vector<2x32xf32>
    %265 = vector.extract_strided_slice %262 {offsets = [0, 96], sizes = [2, 32], strides = [1, 1]} : vector<2x128xf32> to vector<2x32xf32>
    %266 = vector.extract_strided_slice %257 {offsets = [0, 64], sizes = [2, 32], strides = [1, 1]} : vector<2x128xf32> to vector<2x32xf32>
    %267 = math.tanh %266 : vector<2x32xf32>
    %268 = arith.mulf %264, %250 : vector<2x32xf32>
    %269 = arith.mulf %263, %267 : vector<2x32xf32>
    %270 = arith.addf %268, %269 : vector<2x32xf32>
    %271 = math.tanh %270 : vector<2x32xf32>
    %272 = arith.mulf %265, %271 : vector<2x32xf32>
    %c6_114 = arith.constant 6 : index
    %c0_115 = arith.constant 0 : index
    %273 = vector.load %arg16[%c6_114, %c0_115] : memref<16x128xf32, #tpu.memory_space<vmem>>, vector<2x128xf32>
    %274 = arith.truncf %272 : vector<2x32xf32> to vector<2x32xbf16>
    %c0_116 = arith.constant 0 : index
    %c0_117 = arith.constant 0 : index
    %275 = vector.load %arg9[%c0_116, %c0_117] : memref<32x128xbf16, #tpu.memory_space<vmem>>, vector<32x128xbf16>
    %cst_118 = arith.constant dense<0.000000e+00> : vector<2x128xf32>
    %276 = tpu.matmul %274, %275, %cst_118 {dimension_numbers = #tpu.dot_dimension_numbers<[1], [0], [0], [1], [0, 0, 1, 1], [], []>} : vector<2x32xbf16>, vector<32x128xbf16>, vector<2x128xf32> -> vector<2x128xf32>
    %277 = arith.addf %273, %276 : vector<2x128xf32>
    %278 = arith.negf %277 : vector<2x128xf32>
    %279 = math.exp %278 : vector<2x128xf32>
    %cst_119 = arith.constant 1.000000e+00 : f32
    %280 = vector.broadcast %cst_119 : f32 to vector<2x128xf32>
    %281 = arith.addf %280, %279 : vector<2x128xf32>
    %282 = arith.divf %280, %281 : vector<2x128xf32>
    %283 = vector.extract_strided_slice %282 {offsets = [0, 0], sizes = [2, 32], strides = [1, 1]} : vector<2x128xf32> to vector<2x32xf32>
    %284 = vector.extract_strided_slice %282 {offsets = [0, 32], sizes = [2, 32], strides = [1, 1]} : vector<2x128xf32> to vector<2x32xf32>
    %285 = vector.extract_strided_slice %282 {offsets = [0, 96], sizes = [2, 32], strides = [1, 1]} : vector<2x128xf32> to vector<2x32xf32>
    %286 = vector.extract_strided_slice %277 {offsets = [0, 64], sizes = [2, 32], strides = [1, 1]} : vector<2x128xf32> to vector<2x32xf32>
    %287 = math.tanh %286 : vector<2x32xf32>
    %288 = arith.mulf %284, %270 : vector<2x32xf32>
    %289 = arith.mulf %283, %287 : vector<2x32xf32>
    %290 = arith.addf %288, %289 : vector<2x32xf32>
    %291 = math.tanh %290 : vector<2x32xf32>
    %292 = arith.mulf %285, %291 : vector<2x32xf32>
    %c8_120 = arith.constant 8 : index
    %c0_121 = arith.constant 0 : index
    %293 = vector.load %arg16[%c8_120, %c0_121] : memref<16x128xf32, #tpu.memory_space<vmem>>, vector<2x128xf32>
    %294 = arith.truncf %292 : vector<2x32xf32> to vector<2x32xbf16>
    %c0_122 = arith.constant 0 : index
    %c0_123 = arith.constant 0 : index
    %295 = vector.load %arg9[%c0_122, %c0_123] : memref<32x128xbf16, #tpu.memory_space<vmem>>, vector<32x128xbf16>
    %cst_124 = arith.constant dense<0.000000e+00> : vector<2x128xf32>
    %296 = tpu.matmul %294, %295, %cst_124 {dimension_numbers = #tpu.dot_dimension_numbers<[1], [0], [0], [1], [0, 0, 1, 1], [], []>} : vector<2x32xbf16>, vector<32x128xbf16>, vector<2x128xf32> -> vector<2x128xf32>
    %297 = arith.addf %293, %296 : vector<2x128xf32>
    %298 = arith.negf %297 : vector<2x128xf32>
    %299 = math.exp %298 : vector<2x128xf32>
    %cst_125 = arith.constant 1.000000e+00 : f32
    %300 = vector.broadcast %cst_125 : f32 to vector<2x128xf32>
    %301 = arith.addf %300, %299 : vector<2x128xf32>
    %302 = arith.divf %300, %301 : vector<2x128xf32>
    %303 = vector.extract_strided_slice %302 {offsets = [0, 0], sizes = [2, 32], strides = [1, 1]} : vector<2x128xf32> to vector<2x32xf32>
    %304 = vector.extract_strided_slice %302 {offsets = [0, 32], sizes = [2, 32], strides = [1, 1]} : vector<2x128xf32> to vector<2x32xf32>
    %305 = vector.extract_strided_slice %302 {offsets = [0, 96], sizes = [2, 32], strides = [1, 1]} : vector<2x128xf32> to vector<2x32xf32>
    %306 = vector.extract_strided_slice %297 {offsets = [0, 64], sizes = [2, 32], strides = [1, 1]} : vector<2x128xf32> to vector<2x32xf32>
    %307 = math.tanh %306 : vector<2x32xf32>
    %308 = arith.mulf %304, %290 : vector<2x32xf32>
    %309 = arith.mulf %303, %307 : vector<2x32xf32>
    %310 = arith.addf %308, %309 : vector<2x32xf32>
    %311 = math.tanh %310 : vector<2x32xf32>
    %312 = arith.mulf %305, %311 : vector<2x32xf32>
    %c10_126 = arith.constant 10 : index
    %c0_127 = arith.constant 0 : index
    %313 = vector.load %arg16[%c10_126, %c0_127] : memref<16x128xf32, #tpu.memory_space<vmem>>, vector<2x128xf32>
    %314 = arith.truncf %312 : vector<2x32xf32> to vector<2x32xbf16>
    %c0_128 = arith.constant 0 : index
    %c0_129 = arith.constant 0 : index
    %315 = vector.load %arg9[%c0_128, %c0_129] : memref<32x128xbf16, #tpu.memory_space<vmem>>, vector<32x128xbf16>
    %cst_130 = arith.constant dense<0.000000e+00> : vector<2x128xf32>
    %316 = tpu.matmul %314, %315, %cst_130 {dimension_numbers = #tpu.dot_dimension_numbers<[1], [0], [0], [1], [0, 0, 1, 1], [], []>} : vector<2x32xbf16>, vector<32x128xbf16>, vector<2x128xf32> -> vector<2x128xf32>
    %317 = arith.addf %313, %316 : vector<2x128xf32>
    %318 = arith.negf %317 : vector<2x128xf32>
    %319 = math.exp %318 : vector<2x128xf32>
    %cst_131 = arith.constant 1.000000e+00 : f32
    %320 = vector.broadcast %cst_131 : f32 to vector<2x128xf32>
    %321 = arith.addf %320, %319 : vector<2x128xf32>
    %322 = arith.divf %320, %321 : vector<2x128xf32>
    %323 = vector.extract_strided_slice %322 {offsets = [0, 0], sizes = [2, 32], strides = [1, 1]} : vector<2x128xf32> to vector<2x32xf32>
    %324 = vector.extract_strided_slice %322 {offsets = [0, 32], sizes = [2, 32], strides = [1, 1]} : vector<2x128xf32> to vector<2x32xf32>
    %325 = vector.extract_strided_slice %322 {offsets = [0, 96], sizes = [2, 32], strides = [1, 1]} : vector<2x128xf32> to vector<2x32xf32>
    %326 = vector.extract_strided_slice %317 {offsets = [0, 64], sizes = [2, 32], strides = [1, 1]} : vector<2x128xf32> to vector<2x32xf32>
    %327 = math.tanh %326 : vector<2x32xf32>
    %328 = arith.mulf %324, %310 : vector<2x32xf32>
    %329 = arith.mulf %323, %327 : vector<2x32xf32>
    %330 = arith.addf %328, %329 : vector<2x32xf32>
    %331 = math.tanh %330 : vector<2x32xf32>
    %332 = arith.mulf %325, %331 : vector<2x32xf32>
    %c12_132 = arith.constant 12 : index
    %c0_133 = arith.constant 0 : index
    %333 = vector.load %arg16[%c12_132, %c0_133] : memref<16x128xf32, #tpu.memory_space<vmem>>, vector<2x128xf32>
    %334 = arith.truncf %332 : vector<2x32xf32> to vector<2x32xbf16>
    %c0_134 = arith.constant 0 : index
    %c0_135 = arith.constant 0 : index
    %335 = vector.load %arg9[%c0_134, %c0_135] : memref<32x128xbf16, #tpu.memory_space<vmem>>, vector<32x128xbf16>
    %cst_136 = arith.constant dense<0.000000e+00> : vector<2x128xf32>
    %336 = tpu.matmul %334, %335, %cst_136 {dimension_numbers = #tpu.dot_dimension_numbers<[1], [0], [0], [1], [0, 0, 1, 1], [], []>} : vector<2x32xbf16>, vector<32x128xbf16>, vector<2x128xf32> -> vector<2x128xf32>
    %337 = arith.addf %333, %336 : vector<2x128xf32>
    %338 = arith.negf %337 : vector<2x128xf32>
    %339 = math.exp %338 : vector<2x128xf32>
    %cst_137 = arith.constant 1.000000e+00 : f32
    %340 = vector.broadcast %cst_137 : f32 to vector<2x128xf32>
    %341 = arith.addf %340, %339 : vector<2x128xf32>
    %342 = arith.divf %340, %341 : vector<2x128xf32>
    %343 = vector.extract_strided_slice %342 {offsets = [0, 0], sizes = [2, 32], strides = [1, 1]} : vector<2x128xf32> to vector<2x32xf32>
    %344 = vector.extract_strided_slice %342 {offsets = [0, 32], sizes = [2, 32], strides = [1, 1]} : vector<2x128xf32> to vector<2x32xf32>
    %345 = vector.extract_strided_slice %342 {offsets = [0, 96], sizes = [2, 32], strides = [1, 1]} : vector<2x128xf32> to vector<2x32xf32>
    %346 = vector.extract_strided_slice %337 {offsets = [0, 64], sizes = [2, 32], strides = [1, 1]} : vector<2x128xf32> to vector<2x32xf32>
    %347 = math.tanh %346 : vector<2x32xf32>
    %348 = arith.mulf %344, %330 : vector<2x32xf32>
    %349 = arith.mulf %343, %347 : vector<2x32xf32>
    %350 = arith.addf %348, %349 : vector<2x32xf32>
    %351 = math.tanh %350 : vector<2x32xf32>
    %352 = arith.mulf %345, %351 : vector<2x32xf32>
    %c14_138 = arith.constant 14 : index
    %c0_139 = arith.constant 0 : index
    %353 = vector.load %arg16[%c14_138, %c0_139] : memref<16x128xf32, #tpu.memory_space<vmem>>, vector<2x128xf32>
    %354 = arith.truncf %352 : vector<2x32xf32> to vector<2x32xbf16>
    %c0_140 = arith.constant 0 : index
    %c0_141 = arith.constant 0 : index
    %355 = vector.load %arg9[%c0_140, %c0_141] : memref<32x128xbf16, #tpu.memory_space<vmem>>, vector<32x128xbf16>
    %cst_142 = arith.constant dense<0.000000e+00> : vector<2x128xf32>
    %356 = tpu.matmul %354, %355, %cst_142 {dimension_numbers = #tpu.dot_dimension_numbers<[1], [0], [0], [1], [0, 0, 1, 1], [], []>} : vector<2x32xbf16>, vector<32x128xbf16>, vector<2x128xf32> -> vector<2x128xf32>
    %357 = arith.addf %353, %356 : vector<2x128xf32>
    %358 = arith.negf %357 : vector<2x128xf32>
    %359 = math.exp %358 : vector<2x128xf32>
    %cst_143 = arith.constant 1.000000e+00 : f32
    %360 = vector.broadcast %cst_143 : f32 to vector<2x128xf32>
    %361 = arith.addf %360, %359 : vector<2x128xf32>
    %362 = arith.divf %360, %361 : vector<2x128xf32>
    %363 = vector.extract_strided_slice %362 {offsets = [0, 0], sizes = [2, 32], strides = [1, 1]} : vector<2x128xf32> to vector<2x32xf32>
    %364 = vector.extract_strided_slice %362 {offsets = [0, 32], sizes = [2, 32], strides = [1, 1]} : vector<2x128xf32> to vector<2x32xf32>
    %365 = vector.extract_strided_slice %362 {offsets = [0, 96], sizes = [2, 32], strides = [1, 1]} : vector<2x128xf32> to vector<2x32xf32>
    %366 = vector.extract_strided_slice %357 {offsets = [0, 64], sizes = [2, 32], strides = [1, 1]} : vector<2x128xf32> to vector<2x32xf32>
    %367 = math.tanh %366 : vector<2x32xf32>
    %368 = arith.mulf %364, %350 : vector<2x32xf32>
    %369 = arith.mulf %363, %367 : vector<2x32xf32>
    %370 = arith.addf %368, %369 : vector<2x32xf32>
    %371 = math.tanh %370 : vector<2x32xf32>
    %372 = arith.mulf %365, %371 : vector<2x32xf32>
    %c1_144 = arith.constant 1 : index
    %c0_145 = arith.constant 0 : index
    %c0_146 = arith.constant 0 : index
    %373 = vector.load %arg14[%c1_144, %c0_145, %c0_146] : memref<2x2x32xf32, #tpu.memory_space<vmem>>, vector<1x2x32xf32>
    %374 = vector.shape_cast %373 : vector<1x2x32xf32> to vector<2x32xf32>
    %375 = vector.shape_cast %372 : vector<2x32xf32> to vector<1x2x32xf32>
    tpu.vector_store %arg14[%c1_144, %c0_145, %c0_146], %375 {strides = array<i32>} : memref<2x2x32xf32, #tpu.memory_space<vmem>>, vector<1x2x32xf32>,
    %c1_147 = arith.constant 1 : index
    %c0_148 = arith.constant 0 : index
    %c0_149 = arith.constant 0 : index
    %376 = vector.load %arg15[%c1_147, %c0_148, %c0_149] : memref<2x2x32xf32, #tpu.memory_space<vmem>>, vector<1x2x32xf32>
    %377 = vector.shape_cast %376 : vector<1x2x32xf32> to vector<2x32xf32>
    %378 = vector.shape_cast %370 : vector<2x32xf32> to vector<1x2x32xf32>
    tpu.vector_store %arg15[%c1_147, %c0_148, %c0_149], %378 {strides = array<i32>} : memref<2x2x32xf32, #tpu.memory_space<vmem>>, vector<1x2x32xf32>,
    %379 = arith.truncf %372 : vector<2x32xf32> to vector<2x32xbf16>
    %c0_150 = arith.constant 0 : index
    %c0_151 = arith.constant 0 : index
    %380 = vector.load %arg11[%c0_150, %c0_151] : memref<32x4xbf16, #tpu.memory_space<vmem>>, vector<32x4xbf16>
    %cst_152 = arith.constant dense<0.000000e+00> : vector<2x4xf32>
    %381 = tpu.matmul %379, %380, %cst_152 {dimension_numbers = #tpu.dot_dimension_numbers<[1], [0], [0], [1], [0, 0, 1, 1], [], []>} : vector<2x32xbf16>, vector<32x4xbf16>, vector<2x4xf32> -> vector<2x4xf32>
    %c0_153 = arith.constant 0 : index
    %c0_154 = arith.constant 0 : index
    %382 = vector.load %arg12[%c0_153, %c0_154] : memref<1x4xf32, #tpu.memory_space<vmem>>, vector<1x4xf32>
    %383 = vector.broadcast %382 : vector<1x4xf32> to vector<2x4xf32>
    %384 = arith.addf %381, %383 : vector<2x4xf32>
    %385 = arith.negf %384 : vector<2x4xf32>
    %386 = math.exp %385 : vector<2x4xf32>
    %cst_155 = arith.constant 1.000000e+00 : f32
    %387 = vector.broadcast %cst_155 : f32 to vector<2x4xf32>
    %388 = arith.addf %387, %386 : vector<2x4xf32>
    %389 = arith.divf %387, %388 : vector<2x4xf32>
    %390 = vector.shape_cast %389 : vector<2x4xf32> to vector<2x1x4xf32>
    %c0_156 = arith.constant 0 : index
    %c0_157 = arith.constant 0 : index
    %c0_158 = arith.constant 0 : index
    %391 = vector.load %arg13[%c0_156, %c0_157, %c0_158] : memref<2x1x4xf32, #tpu.memory_space<vmem>>, vector<2x1x4xf32>
    tpu.vector_store %arg13[%c0_156, %c0_157, %c0_158], %390 {strides = array<i32>} : memref<2x1x4xf32, #tpu.memory_space<vmem>>, vector<2x1x4xf32>,
    return
  }
}

</mosaic_0001>

<bundles_post_ra>
// kernel: tpu_custom_call.1
= control target key start
LH: loop header
LB: loop body
LE: loop exit
PB: predicated region body
PF: predicated region fallthrough
CT: control target
= control target key end

     0   :  { %21 = vsyncpa [#allocation5], 0  ;;  %s3091_s0 = inlined_call_operand.vmem [shape: f32[16,16], index: 0, kind: input, shape index: {}]   ;;  %s3092_s1 = inlined_call_operand.hbm [shape: f32[2,2,32], index: 1, kind: input, shape index: {}]   ;;  %s3093_s2 = inlined_call_operand.hbm [shape: f32[2,2,32], index: 2, kind: input, shape index: {}]   ;;  %s3094_s3 = inlined_call_operand.hbm [shape: bf16[16,32], index: 3, kind: input, shape index: {}]   ;;  %s3095_s4 = inlined_call_operand.hbm [shape: f32[1,32], index: 4, kind: input, shape index: {}]   ;;  %s3096_s5 = inlined_call_operand.vmem [shape: bf16[32,128], index: 5, kind: input, shape index: {}]   ;;  %s3097_s6 = inlined_call_operand.hbm [shape: bf16[32,128], index: 6, kind: input, shape index: {}]   ;;  %s3098_s7 = inlined_call_operand.hbm [shape: f32[1,128], index: 7, kind: input, shape index: {}]   ;;  %s3099_s8 = inlined_call_operand.vmem [shape: bf16[32,128], index: 8, kind: input, shape index: {}]   ;;  %s3100_s9 = inlined_call_operand.hbm [shape: bf16[32,128], index: 9, kind: input, shape index: {}]   ;;  %s3101_s10 = inlined_call_operand.vmem [shape: f32[1,128], index: 10, kind: input, shape index: {}]   ;;  %s3102_s11 = inlined_call_operand.vmem [shape: bf16[32,4], index: 11, kind: input, shape index: {}]   ;;  %s3103_s12 = inlined_call_operand.vmem [shape: f32[1,4], index: 12, kind: input, shape index: {}]   ;;  %s3104_s13 = inlined_call_operand.hbm [shape: f32[2,1,4], index: 13, kind: output, shape index: {0}]   ;;  %s3105_s14 = inlined_call_operand.hbm [shape: f32[2,2,32], index: 14, kind: output, shape index: {1}]   ;;  %s3106_s15 = inlined_call_operand.hbm [shape: f32[2,2,32], index: 15, kind: output, shape index: {2}]  }
   0x1   :  { %22 = vsyncpa [#allocation8], 0 }
   0x2   :  { %23 = vsyncpa [#allocation11], 0 }
   0x3   :  { %24 = vsyncpa [#allocation14], 0 }
   0x4   :  { %25 = vsyncpa [#allocation6], 0 }
   0x5   :  { %26 = vsyncpa [#allocation18], 0  ;;  %s2584_s18 = smov [#allocation7]   ;;  %s2585_s20 = smov [#allocation10]  }
   0x6   :  { %s46_s19 = sshll.u32 %s2584_s18, 4  ;;  %s71_s21 = sshll.u32 %s2585_s20, 4  ;;  %s47_s19 = int_to_ptr.vmem [resolvable:$true] %s46_s19  ;;  %s2684_s21 = int_to_ptr.vmem [resolvable:$true] %s71_s21 }
   0x7   :  { %s2352_s24 = scalar_lea.hbm %s3093_s2, 64 }
   0x8   :  { %p2353_p0 = scmp.ne.s32.totalorder %s3093_s2, %s2352_s24  ;;  %p2356_p1 = scmp.lt.u32.totalorder %s2352_s24, %s3093_s2 }
   0xa   :  { %p2358_p2 = pnand %p2356_p1, %p2353_p0 }
   0xc   :  { %2361 = shalt.err (!%p2358_p2)
}
   0xd   :  { %s2362_s29 = scalar_lea.vmem %s47_s19, 64  ;;  %p2367_p4 = scmp.lt.s32.totalorder %s47_s19, %s47_s19 }
   0xe   :  { %p2363_p3 = scmp.ne.s32.totalorder %s47_s19, %s2362_s29  ;;  %p2368_p5 = scmp.lt.s32.totalorder %s2362_s29, %s2362_s29 }
  0x10   :  { %p2369_p6 = por %p2368_p5, %p2367_p4 }
  0x12   :  { %p2370_p7 = pnand %p2369_p6, %p2363_p3 }
  0x14   :  { %2373 = shalt.err (!%p2370_p7)
}
  0x15   :  { %s2586_s30 = smov 32   ;;  %s2587_s16 = smov 2  }
  0x16   :  { %52 = dma.hbm_to_vmem [thread:$0]  %s3093_s2, 64, %s47_s19, [#allocation8], %s2586_s30, %s2586_s30, %s2587_s16  }
  0x17   :  { %s2374_s23 = scalar_lea.hbm %s3095_s4, 16 }
  0x18   :  { %p2375_p8 = scmp.ne.s32.totalorder %s3095_s4, %s2374_s23  ;;  %p2378_p9 = scmp.lt.u32.totalorder %s2374_s23, %s3095_s4 }
  0x1a   :  { %p2380_p10 = pnand %p2378_p9, %p2375_p8 }
  0x1c   :  { %2383 = shalt.err (!%p2380_p10)
}
  0x1d   :  { %s2384_s28 = scalar_lea.vmem %s2684_s21, 16  ;;  %s2388_s2 = scalar_lea.vmem %s2684_s21, 32 }
  0x1e   :  { %p2385_p11 = scmp.ne.s32.totalorder %s2684_s21, %s2384_s28  ;;  %p2389_p12 = scmp.lt.s32.totalorder %s2684_s21, %s2684_s21 }
  0x1f   :  { %p2390_p13 = scmp.lt.s32.totalorder %s2388_s2, %s2384_s28 }
  0x21   :  { %p2391_p0 = por %p2390_p13, %p2389_p12 }
  0x23   :  { %p2392_p1 = pnand %p2391_p0, %p2385_p11 }
  0x25   :  { %2395 = shalt.err (!%p2392_p1)
}
  0x26   :  { %74 = dma.hbm_to_vmem [thread:$0]  %s3095_s4, 16, %s2684_s21, [#allocation11]  }
  0x27   :  { %s2588_s17 = smov [#allocation13]   ;;  %s2589_s20 = smov [#allocation4]  }
  0x28   :  { %s95_s18 = sshll.u32 %s2588_s17, 4  ;;  %s34_s22 = sshll.u32 %s2589_s20, 4  ;;  %s96_s18 = int_to_ptr.vmem [resolvable:$true] %s95_s18  ;;  %s2719_s22 = int_to_ptr.vmem [resolvable:$true] %s34_s22 }
  0x29   :  { %s2396_s25 = scalar_lea.hbm %s3098_s7, 16 }
  0x2a   :  { %p2397_p2 = scmp.ne.s32.totalorder %s3098_s7, %s2396_s25  ;;  %p2400_p3 = scmp.lt.u32.totalorder %s2396_s25, %s3098_s7 }
  0x2c   :  { %p2402_p4 = pnand %p2400_p3, %p2397_p2 }
  0x2e   :  { %2405 = shalt.err (!%p2402_p4)
}
  0x2f   :  { %s2406_s4 = scalar_lea.vmem %s96_s18, 16  ;;  %s2410_s21 = scalar_lea.vmem %s96_s18, 32 }
  0x30   :  { %p2407_p5 = scmp.ne.s32.totalorder %s96_s18, %s2406_s4  ;;  %p2411_p6 = scmp.lt.s32.totalorder %s96_s18, %s96_s18 }
  0x31   :  { %p2412_p7 = scmp.lt.s32.totalorder %s2410_s21, %s2406_s4 }
  0x33   :  { %p2413_p8 = por %p2412_p7, %p2411_p6 }
  0x35   :  { %p2414_p9 = pnand %p2413_p8, %p2407_p5 }
  0x37   :  { %2417 = shalt.err (!%p2414_p9)
}
  0x38   :  { %98 = dma.hbm_to_vmem [thread:$0]  %s3098_s7, 16, %s96_s18, [#allocation14]  }
  0x39   :  { %s2418_s23 = scalar_lea.hbm %s3092_s1, 64 }
  0x3a   :  { %p2419_p10 = scmp.ne.s32.totalorder %s3092_s1, %s2418_s23  ;;  %p2422_p11 = scmp.lt.u32.totalorder %s2418_s23, %s3092_s1 }
  0x3c   :  { %p2424_p12 = pnand %p2422_p11, %p2419_p10 }
  0x3e   :  { %2427 = shalt.err (!%p2424_p12)
}
  0x3f   :  { %s2428_s28 = scalar_lea.vmem %s2719_s22, 64  ;;  %p2433_p0 = scmp.lt.s32.totalorder %s2719_s22, %s2719_s22 }
  0x40   :  { %p2429_p13 = scmp.ne.s32.totalorder %s2719_s22, %s2428_s28  ;;  %p2434_p1 = scmp.lt.s32.totalorder %s2428_s28, %s2428_s28 }
  0x42   :  { %p2435_p2 = por %p2434_p1, %p2433_p0 }
  0x44   :  { %p2436_p3 = pnand %p2435_p2, %p2429_p13 }
  0x46   :  { %2439 = shalt.err (!%p2436_p3)
}
  0x47   :  { %40 = dma.hbm_to_vmem [thread:$0]  %s3092_s1, 64, %s2719_s22, [#allocation5], %s2586_s30, %s2586_s30, %s2587_s16  }
  0x48   :  { %s2590_s2 = smov [#allocation9]   ;;  %s2440_s29 = scalar_lea.hbm %s3094_s3, 128 }
  0x49   :  { %s58_s4 = sshll.u32 %s2590_s2, 4  ;;  %p2441_p4 = scmp.ne.s32.totalorder %s3094_s3, %s2440_s29  ;;  %s59_s4 = int_to_ptr.vmem [resolvable:$true] %s58_s4 }
  0x4a   :  { %p2444_p5 = scmp.lt.u32.totalorder %s2440_s29, %s3094_s3 }
  0x4c   :  { %p2446_p6 = pnand %p2444_p5, %p2441_p4 }
  0x4e   :  { %2449 = shalt.err (!%p2446_p6)
}
  0x4f   :  { %s2450_s25 = scalar_lea.vmem %s59_s4, 128  ;;  %p2455_p8 = scmp.lt.s32.totalorder %s59_s4, %s59_s4 }
  0x50   :  { %p2451_p7 = scmp.ne.s32.totalorder %s59_s4, %s2450_s25  ;;  %p2456_p9 = scmp.lt.s32.totalorder %s2450_s25, %s2450_s25 }
  0x52   :  { %p2457_p10 = por %p2456_p9, %p2455_p8 }
  0x54   :  { %p2458_p11 = pnand %p2457_p10, %p2451_p7 }
  0x56   :  { %2461 = shalt.err (!%p2458_p11)
}
  0x57   :  { %s2591_s1 = smov 64   ;;  %s2592_s22 = smov 4  }
  0x58   :  { %64 = dma.hbm_to_vmem [thread:$0]  %s3094_s3, 128, %s59_s4, [#allocation8], %s2591_s1, %s2591_s1, %s2592_s22  }
  0x59   :  { %s2593_s28 = smov [#allocation12]   ;;  %s2594_s18 = smov [#allocation15]  }
  0x5a   :  { %s82_s7 = sshll.u32 %s2593_s28, 4  ;;  %s106_s2 = sshll.u32 %s2594_s18, 4  ;;  %s83_s7 = int_to_ptr.vmem [resolvable:$true] %s82_s7  ;;  %s107_s2 = int_to_ptr.vmem [resolvable:$true] %s106_s2 }
  0x5b   :  { %s2462_s29 = scalar_lea.hbm %s3097_s6, 256 }
  0x5c   :  { %p2463_p12 = scmp.ne.s32.totalorder %s3097_s6, %s2462_s29  ;;  %p2466_p13 = scmp.lt.u32.totalorder %s2462_s29, %s3097_s6 }
  0x5e   :  { %p2468_p0 = pnand %p2466_p13, %p2463_p12 }
  0x60   :  { %2471 = shalt.err (!%p2468_p0)
}
  0x61   :  { %s2472_s3 = scalar_lea.vmem %s83_s7, 256  ;;  %p2477_p2 = scmp.lt.s32.totalorder %s83_s7, %s83_s7 }
  0x62   :  { %p2473_p1 = scmp.ne.s32.totalorder %s83_s7, %s2472_s3  ;;  %p2478_p3 = scmp.lt.s32.totalorder %s2472_s3, %s2472_s3 }
  0x64   :  { %p2479_p4 = por %p2478_p3, %p2477_p2 }
  0x66   :  { %p2480_p5 = pnand %p2479_p4, %p2473_p1 }
  0x68   :  { %2483 = shalt.err (!%p2480_p5)
}
  0x69   :  { %88 = dma.hbm_to_vmem [thread:$0]  %s3097_s6, 256, %s83_s7, [#allocation11], %s2591_s1, %s2591_s1, %s2592_s22  }
  0x6a   :  { %s2484_s28 = scalar_lea.hbm %s3100_s9, 256 }
  0x6b   :  { %p2485_p6 = scmp.ne.s32.totalorder %s3100_s9, %s2484_s28  ;;  %p2488_p7 = scmp.lt.u32.totalorder %s2484_s28, %s3100_s9 }
  0x6d   :  { %p2490_p8 = pnand %p2488_p7, %p2485_p6 }
  0x6f   :  { %2493 = shalt.err (!%p2490_p8)
}
  0x70   :  { %s2494_s17 = scalar_lea.vmem %s107_s2, 256  ;;  %p2499_p10 = scmp.lt.s32.totalorder %s107_s2, %s107_s2 }
  0x71   :  { %p2495_p9 = scmp.ne.s32.totalorder %s107_s2, %s2494_s17  ;;  %p2500_p11 = scmp.lt.s32.totalorder %s2494_s17, %s2494_s17 }
  0x73   :  { %p2501_p12 = por %p2500_p11, %p2499_p10 }
  0x75   :  { %p2502_p13 = pnand %p2501_p12, %p2495_p9 }
  0x77   :  { %2505 = shalt.err (!%p2502_p13)
}
  0x78   :  { %112 = dma.hbm_to_vmem [thread:$0]  %s3100_s9, 256, %s107_s2, [#allocation14], %s2591_s1, %s2591_s1, %s2592_s22  }
  0x79   :  { %2572 = dma.done.wait [#allocation5], 64  }
  0x7a   :  { %2573 = vsyncadd [#allocation5], 4294967232 }
  0x7b   :  { %2574 = dma.done.wait [#allocation8], 192  }
  0x7c   :  { %2575 = vsyncadd [#allocation8], 4294967104 }
  0x7d   :  { %2576 = dma.done.wait [#allocation11], 272  }
  0x7e   :  { %2577 = vsyncadd [#allocation11], 4294967024 }
  0x7f   :  { %2578 = dma.done.wait [#allocation14], 272  }
  0x80   :  { %2579 = vsyncadd [#allocation14], 4294967024  ;;  %v2595_v0 = vmov 0.0   ;;  %vm2596_vm0 = vmmov 0   ;;  %v2195_v1 = vld [vmem:[#allocation9] sm:$0xff]   ;;  %v142_v3 = vld [vmem:[%s3091_s0 + $0x8] sm:$0xff] }
  0x81   :  { %2017 = vmatprep.subr.bf16.mxu0 %v2595_v0  ;;  %2019 = vmatprep.mubr.msk.bf16.mxu0 %vm2596_vm0, %v2595_v0  ;;  %v141_v2 = vld [vmem:[%s3091_s0] sm:$0xff]  ;;  %vm159_vm1 = vcmask 130048   ;;  %v2197_v6 = vld [vmem:[%s3096_s5 + $0x8] sm:$0xff]   ;;  %v2199_v8 = vld [vmem:[#allocation12 + $0x8] sm:$0xff]   ;;  %vm230_vm2 = vcmask 261120   ;;  %vm374_vm3 = vcmask 253952  }
  0x82   :  { %2023 = vmatprep.subr.bf16.mxu1 %v2595_v0  ;;  %2027 = vmatprep.mubr.msk.bf16.mxu1 %vm2596_vm0, %v2595_v0  ;;  %v143_v4 = vpack.c.bf16 %v142_v3, %v141_v2  ;;  %v2196_v5 = vld [vmem:[%s3096_s5] sm:$0xff]   ;;  %v2198_v7 = vld [vmem:[#allocation12] sm:$0xff]   ;;  %v277_v9 = vld [vmem:[#allocation4] sm:$0x3]  ;;  %vm467_vm4 = vcmask 254977   ;;  %vm657_vm5 = vcmask 257027  }
  0x83   :  { %2018 = vmatpush3.bf16.msra.mxu0 %v2195_v1  ;;  %2024 = vmatpush3.bf16.msra.mxu1 %v2196_v5  ;;  %v280_v10 = vpack.c.bf16 %v277_v9, %v277_v9  ;;  %v1892_v11 = vld [vmem:[#allocation10] ss:$0 sm:$0xff]  ;;  %v1895_v25 = vld [vmem:[#allocation13] ss:$0 sm:$0xff]  ;;  %v278_v35 = vld [vmem:[#allocation7] sm:$0x3] }
  0x84   :  { %2031 = vmatprep.subr.bf16.mxu0 %v2595_v0  ;;  %2025 = vmatprep.subr.bf16.mxu1 %v2595_v0  ;;  %v2200_v46 = vld [vmem:[#allocation12] sm:$0xff]   ;;  %v2201_v47 = vld [vmem:[#allocation12 + $0x8] sm:$0xff]   ;;  %vm847_vm6 = vcmask 259077   ;;  %vm562_vm7 = vcmask 256002   ;;  %vm752_vm8 = vcmask 258052   ;;  %vm942_vm9 = vcmask 260102  }
  0x85   :  { %vm1037_vm10 = vcmask 261127   ;;  %s2597_s19 = smov 96   ;;  %vm1043_vm11 = vcmask 254976  }
  0x86   :  { %2020 = vmatmul.mubr.msk.bf16.vlgmr.msra.gmra.mrb[0].mxu0 %vm159_vm1, %v143_v4 }
  0x87   :  { %2035 = vmatprep.mubr.msk.bf16.mxu0 %vm2596_vm0, %v2595_v0  ;;  %2026 = vmatpush3.bf16.msra.mxu1 %v2197_v6  ;;  %v2202_v6 = vld [vmem:[#allocation12] sm:$0xff]  }
  0x88   :  { %2039 = vmatprep.subr.bf16.mxu1 %v2595_v0  ;;  %2032 = vmatpush3.bf16.msra.mxu0 %v2198_v7  ;;  %v2203_v7 = vld [vmem:[#allocation12 + $0x8] sm:$0xff]  }
  0x89   :  { %2033 = vmatprep.subr.bf16.mxu0 %v2595_v0 }
  0x8c   :  { %2034 = vmatpush3.bf16.msra.mxu0 %v2199_v8 }
  0x8d   :  { %2047 = vmatprep.subr.bf16.mxu0 %v2595_v0 }
  0x8f   :  { %2036 = vmatmul.mubr.msk.bf16.vlgmr.msra.gmra.mrb[4].mxu0 %vm230_vm2, %v280_v10 }
  0x90   :  { %2051 = vmatprep.mubr.msk.bf16.mxu0 %vm2596_vm0, %v2595_v0  ;;  %2048 = vmatpush3.bf16.msra.mxu0 %v2202_v6 }
  0x91   :  { %2049 = vmatprep.subr.bf16.mxu0 %v2595_v0 }
  0x94   :  { %2050 = vmatpush3.bf16.msra.mxu0 %v2203_v7 }
  0x95   :  { %2063 = vmatprep.subr.bf16.mxu0 %v2595_v0 }
 0x159   :  { %v197_v12 = vpop.f32.mrb[0].mxu0 }
 0x15a   :  { %v198_v13 = vadd.f32 %v1892_v11, %v197_v12  ;;  %v2021_v14 = vpop.f32.mrb[1].mxu0 }
 0x15b   :  { %v200_v15 = vpop.f32.mrb[2].mxu0 }
 0x15c   :  { %v201_v16 = vadd.f32 %v1892_v11, %v200_v15  ;;  %v2022_v17 = vpop.f32.mrb[3].mxu0  ;;  %v204_v18 = vmax.f32 %v198_v13, 0.0 }
 0x15e   :  { %v205_v19 = vmax.f32 %v201_v16, 0.0 }
 0x160   :  { %v206_v20 = vpack.c.bf16 %v205_v19, %v204_v18 }
 0x162   :  { %2028 = vmatmul.mubr.msk.bf16.vlgmr.msra.gmra.mrb[0].mxu1 %vm230_vm2, %v206_v20  ;;  %v334_v21 = vpop.f32.mrb[4].mxu0 }
 0x163   :  { %2043 = vmatprep.mubr.msk.bf16.mxu1 %vm2596_vm0, %v2595_v0  ;;  %v2037_v22 = vpop.f32.mrb[5].mxu0  ;;  %2040 = vmatpush3.bf16.msra.mxu1 %v2200_v46 }
 0x164   :  { %v337_v23 = vpop.f32.mrb[6].mxu0  ;;  %2041 = vmatprep.subr.bf16.mxu1 %v2595_v0 }
 0x165   :  { %v2038_v24 = vpop.f32.mrb[7].mxu0 }
 0x167   :  { %2042 = vmatpush3.bf16.msra.mxu1 %v2201_v47 }
 0x168   :  { %2055 = vmatprep.subr.bf16.mxu1 %v2595_v0 }
 0x235   :  { %v268_v26 = vpop.f32.mrb[0].mxu1 }
 0x236   :  { %v269_v27 = vadd.f32 %v1895_v25, %v268_v26  ;;  %v2029_v28 = vpop.f32.mrb[1].mxu1 }
 0x237   :  { %v271_v29 = vpop.f32.mrb[2].mxu1 }
 0x238   :  { %275 = vst [vmem:[#allocation2] sm:$0xff] %v269_v27  ;;  %v272_v30 = vadd.f32 %v1895_v25, %v271_v29  ;;  %v2030_v31 = vpop.f32.mrb[3].mxu1  ;;  %v2204_v29 = vld [vmem:[#allocation12] sm:$0xff]  }
 0x23a   :  { %276 = vst [vmem:[#allocation2 + $0x8] sm:$0xff] %v272_v30  ;;  %v2205_v30 = vld [vmem:[#allocation12 + $0x8] sm:$0xff]  }
 0x23f   :  { %v279_v32 = vld [vmem:[#allocation2] sm:$0x3]  ;;  %v376_v53 = vld [vmem:[#allocation2 + $0x2] sm:$0x3]  ;;  %v469_v13 = vld [vmem:[#allocation2 + $0x4] sm:$0x3] }
 0x240   :  { %v340_v33 = vadd.f32 %v334_v21, %v279_v32 }
 0x242   :  { %2220 = vtanh.f32 %v340_v33  ;;  %v1902_v36 = vmul.f32 -1.442695, %v340_v33 }
 0x244   :  { %2222 = vpow2.f32 %v1902_v36  ;;  %v564_v36 = vld [vmem:[#allocation2 + $0x6] sm:$0x3] }
 0x24c   :  { %v2221_v34 = vpop.eup %2220 }
 0x24d   :  { %354 = vrot.lane.b32.xlu0 %v2221_v34, %s2591_s1 }
 0x24e   :  { %v2223_v37 = vpop.eup %2222 }
 0x24f   :  { %v344_v38 = vadd.f32 1.0, %v2223_v37 }
 0x251   :  { %349 = vrot.lane.b32.xlu0 %v278_v35, %s2586_s30  ;;  %2224 = vrcp.f32 %v344_v38 }
 0x25b   :  { %v2225_v39 = vpop.eup %2224 }
 0x2bf   :  { %v355_v40 = vpop.permute.xlu0 %354 }
 0x2c0   :  { %v357_v41 = vmul.f32 %v2225_v39, %v355_v40 }
 0x2c2   :  { %359 = vrot.lane.b32.xlu1 %v357_v41, %s2586_s30 }
 0x2c3   :  { %v350_v42 = vpop.permute.xlu0 %349 }
 0x2c4   :  { %v352_v43 = vmul.f32 %v2225_v39, %v350_v42 }
 0x334   :  { %v360_v44 = vpop.permute.xlu1 %359 }
 0x335   :  { %v362_v45 = vadd.f32 %v360_v44, %v352_v43 }
 0x337   :  { %2226 = vtanh.f32 %v362_v45 }
 0x341   :  { %v2227_v48 = vpop.eup %2226 }
 0x342   :  { %365 = vrot.lane.b32.xlu1 %v2227_v48, %s2591_s1 }
 0x3b4   :  { %v366_v49 = vpop.permute.xlu1 %365 }
 0x3b5   :  { %v368_v50 = vmul.f32 %v2225_v39, %v366_v49 }
 0x3b7   :  { %v369_v51 = vpack.c.bf16 %v368_v50, %v368_v50 }
 0x3b9   :  { %371 = vrot.lane.b32.xlu0 %v369_v51, %s2586_s30 }
 0x42b   :  { %v372_v52 = vpop.permute.xlu0 %371 }
 0x42c   :  { %375 = vst.msk [vmem:[#allocation3] sm:$0x1] %vm374_vm3, %v372_v52  ;;  %2044 = vmatmul.mubr.msk.bf16.vlgmr.msra.gmra.mrb[4].mxu1 %vm230_vm2, %v372_v52  ;;  %v2206_v52 = vld [vmem:[#allocation12] sm:$0xff]  }
 0x42d   :  { %2059 = vmatprep.mubr.msk.bf16.mxu1 %vm2596_vm0, %v2595_v0  ;;  %2056 = vmatpush3.bf16.msra.mxu1 %v2204_v29 }
 0x42e   :  { %2057 = vmatprep.subr.bf16.mxu1 %v2595_v0 }
 0x431   :  { %2058 = vmatpush3.bf16.msra.mxu1 %v2205_v30 }
 0x432   :  { %2071 = vmatprep.subr.bf16.mxu1 %v2595_v0 }
 0x4ff   :  { %v430_v54 = vpop.f32.mrb[4].mxu1 }
 0x500   :  { %v436_v55 = vadd.f32 %v430_v54, %v376_v53  ;;  %v2045_v56 = vpop.f32.mrb[5].mxu1  ;;  %v2207_v53 = vld [vmem:[#allocation12 + $0x8] sm:$0xff]  }
 0x501   :  { %v433_v57 = vpop.f32.mrb[6].mxu1 }
 0x502   :  { %2228 = vtanh.f32 %v436_v55  ;;  %v2046_v58 = vpop.f32.mrb[7].mxu1  ;;  %v1906_v60 = vmul.f32 -1.442695, %v436_v55 }
 0x504   :  { %2230 = vpow2.f32 %v1906_v60 }
 0x50c   :  { %v2229_v59 = vpop.eup %2228 }
 0x50d   :  { %446 = vrot.lane.b32.xlu1 %v2229_v59, %s2591_s1  ;;  %v659_v59 = vld [vmem:[#allocation2 + $0x8] sm:$0x3] }
 0x50e   :  { %v2231_v61 = vpop.eup %2230 }
 0x50f   :  { %v440_v62 = vadd.f32 1.0, %v2231_v61 }
 0x511   :  { %2232 = vrcp.f32 %v440_v62 }
 0x51b   :  { %v2233_v63 = vpop.eup %2232 }
 0x51c   :  { %v444_v3 = vmul.f32 %v2233_v63, %v362_v45 }
 0x57f   :  { %v447_v1 = vpop.permute.xlu1 %446 }
 0x580   :  { %v449_v2 = vmul.f32 %v2233_v63, %v447_v1 }
 0x582   :  { %451 = vrot.lane.b32.xlu0 %v449_v2, %s2586_s30 }
 0x5f4   :  { %v452_v4 = vpop.permute.xlu0 %451 }
 0x5f5   :  { %v454_v5 = vadd.f32 %v452_v4, %v444_v3 }
 0x5f7   :  { %2234 = vtanh.f32 %v454_v5 }
 0x601   :  { %v2235_v8 = vpop.eup %2234 }
 0x602   :  { %457 = vrot.lane.b32.xlu1 %v2235_v8, %s2591_s1 }
 0x674   :  { %v458_v9 = vpop.permute.xlu1 %457 }
 0x675   :  { %v460_v10 = vmul.f32 %v2233_v63, %v458_v9 }
 0x677   :  { %v2844_v11 = vpack.c.bf16 %v460_v10, %v460_v10 }
 0x679   :  { %474 = vrot.lane.b32.xlu0 %v2844_v11, %s2586_s30 }
 0x6eb   :  { %v475_v12 = vpop.permute.xlu0 %474 }
 0x6ec   :  { %2052 = vmatmul.mubr.msk.bf16.vlgmr.msra.gmra.mrb[8].mxu0 %vm230_vm2, %v475_v12 }
 0x6ed   :  { %2067 = vmatprep.mubr.msk.bf16.mxu0 %vm2596_vm0, %v2595_v0  ;;  %2064 = vmatpush3.bf16.msra.mxu0 %v2206_v52 }
 0x6ee   :  { %2065 = vmatprep.subr.bf16.mxu0 %v2595_v0 }
 0x6f1   :  { %2066 = vmatpush3.bf16.msra.mxu0 %v2207_v53 }
 0x6f2   :  { %2079 = vmatprep.subr.bf16.mxu0 %v2595_v0 }
 0x7bf   :  { %v525_v14 = vpop.f32.mrb[8].mxu0 }
 0x7c0   :  { %v531_v15 = vadd.f32 %v525_v14, %v469_v13  ;;  %v2053_v16 = vpop.f32.mrb[9].mxu0  ;;  %v2208_v13 = vld [vmem:[#allocation12] sm:$0xff]   ;;  %v2209_v14 = vld [vmem:[#allocation12 + $0x8] sm:$0xff]  }
 0x7c1   :  { %v528_v17 = vpop.f32.mrb[10].mxu0 }
 0x7c2   :  { %2236 = vtanh.f32 %v531_v15  ;;  %v2054_v18 = vpop.f32.mrb[11].mxu0  ;;  %v1910_v20 = vmul.f32 -1.442695, %v531_v15 }
 0x7c4   :  { %2238 = vpow2.f32 %v1910_v20  ;;  %v754_v20 = vld [vmem:[#allocation2 + $0xa] sm:$0x3] }
 0x7cc   :  { %v2237_v19 = vpop.eup %2236 }
 0x7cd   :  { %541 = vrot.lane.b32.xlu1 %v2237_v19, %s2591_s1 }
 0x7ce   :  { %v2239_v21 = vpop.eup %2238 }
 0x7cf   :  { %v535_v22 = vadd.f32 1.0, %v2239_v21 }
 0x7d1   :  { %2240 = vrcp.f32 %v535_v22 }
 0x7db   :  { %v2241_v23 = vpop.eup %2240 }
 0x7dc   :  { %v539_v26 = vmul.f32 %v2241_v23, %v454_v5 }
 0x83f   :  { %v542_v24 = vpop.permute.xlu1 %541 }
 0x840   :  { %v544_v25 = vmul.f32 %v2241_v23, %v542_v24 }
 0x842   :  { %546 = vrot.lane.b32.xlu0 %v544_v25, %s2586_s30 }
 0x8b4   :  { %v547_v27 = vpop.permute.xlu0 %546 }
 0x8b5   :  { %v549_v28 = vadd.f32 %v547_v27, %v539_v26 }
 0x8b7   :  { %2242 = vtanh.f32 %v549_v28 }
 0x8c1   :  { %v2243_v31 = vpop.eup %2242 }
 0x8c2   :  { %552 = vrot.lane.b32.xlu1 %v2243_v31, %s2591_s1 }
 0x934   :  { %v553_v32 = vpop.permute.xlu1 %552 }
 0x935   :  { %v555_v33 = vmul.f32 %v2241_v23, %v553_v32 }
 0x937   :  { %v2856_v34 = vpack.c.bf16 %v555_v33, %v555_v33 }
 0x939   :  { %569 = vrot.lane.b32.xlu0 %v2856_v34, %s2586_s30 }
 0x9ab   :  { %v570_v35 = vpop.permute.xlu0 %569 }
 0x9ac   :  { %2060 = vmatmul.mubr.msk.bf16.vlgmr.msra.gmra.mrb[8].mxu1 %vm230_vm2, %v570_v35 }
 0x9ad   :  { %2075 = vmatprep.mubr.msk.bf16.mxu1 %vm2596_vm0, %v2595_v0  ;;  %2072 = vmatpush3.bf16.msra.mxu1 %v2208_v13 }
 0x9ae   :  { %2073 = vmatprep.subr.bf16.mxu1 %v2595_v0 }
 0x9b1   :  { %2074 = vmatpush3.bf16.msra.mxu1 %v2209_v14 }
 0x9b2   :  { %2087 = vmatprep.subr.bf16.mxu1 %v2595_v0 }
 0xa7f   :  { %v620_v37 = vpop.f32.mrb[8].mxu1 }
 0xa80   :  { %v626_v38 = vadd.f32 %v620_v37, %v564_v36  ;;  %v2061_v39 = vpop.f32.mrb[9].mxu1  ;;  %v2210_v37 = vld [vmem:[#allocation12] sm:$0xff]  }
 0xa81   :  { %v623_v40 = vpop.f32.mrb[10].mxu1 }
 0xa82   :  { %2244 = vtanh.f32 %v626_v38  ;;  %v2062_v41 = vpop.f32.mrb[11].mxu1  ;;  %v1914_v43 = vmul.f32 -1.442695, %v626_v38  ;;  %v2211_v38 = vld [vmem:[#allocation12 + $0x8] sm:$0xff]  }
 0xa84   :  { %2246 = vpow2.f32 %v1914_v43 }
 0xa8c   :  { %v2245_v42 = vpop.eup %2244 }
 0xa8d   :  { %636 = vrot.lane.b32.xlu1 %v2245_v42, %s2591_s1 }
 0xa8e   :  { %v2247_v44 = vpop.eup %2246 }
 0xa8f   :  { %v630_v45 = vadd.f32 1.0, %v2247_v44  ;;  %v849_v44 = vld [vmem:[#allocation2 + $0xc] sm:$0x3] }
 0xa91   :  { %2248 = vrcp.f32 %v630_v45 }
 0xa9b   :  { %v2249_v46 = vpop.eup %2248 }
 0xa9c   :  { %v634_v49 = vmul.f32 %v2249_v46, %v549_v28 }
 0xaff   :  { %v637_v47 = vpop.permute.xlu1 %636 }
 0xb00   :  { %v639_v48 = vmul.f32 %v2249_v46, %v637_v47 }
 0xb02   :  { %641 = vrot.lane.b32.xlu0 %v639_v48, %s2586_s30 }
 0xb74   :  { %v642_v50 = vpop.permute.xlu0 %641 }
 0xb75   :  { %v644_v51 = vadd.f32 %v642_v50, %v634_v49 }
 0xb77   :  { %2250 = vtanh.f32 %v644_v51 }
 0xb81   :  { %v2251_v54 = vpop.eup %2250 }
 0xb82   :  { %647 = vrot.lane.b32.xlu1 %v2251_v54, %s2591_s1 }
 0xbf4   :  { %v648_v55 = vpop.permute.xlu1 %647 }
 0xbf5   :  { %v650_v56 = vmul.f32 %v2249_v46, %v648_v55 }
 0xbf7   :  { %v2868_v57 = vpack.c.bf16 %v650_v56, %v650_v56 }
 0xbf9   :  { %664 = vrot.lane.b32.xlu0 %v2868_v57, %s2586_s30 }
 0xc6b   :  { %v665_v58 = vpop.permute.xlu0 %664 }
 0xc6c   :  { %2068 = vmatmul.mubr.msk.bf16.vlgmr.msra.gmra.mrb[12].mxu0 %vm230_vm2, %v665_v58 }
 0xc6d   :  { %2083 = vmatprep.mubr.msk.bf16.mxu0 %vm2596_vm0, %v2595_v0  ;;  %2080 = vmatpush3.bf16.msra.mxu0 %v2210_v37  ;;  %v1121_v37 = vld [vmem:[#allocation4 + $0x2] sm:$0x3] }
 0xc6e   :  { %2081 = vmatprep.subr.bf16.mxu0 %v2595_v0 }
 0xc71   :  { %2082 = vmatpush3.bf16.msra.mxu0 %v2211_v38 }
 0xc72   :  { %2095 = vmatprep.subr.bf16.mxu0 %v2595_v0 }
 0xd3f   :  { %v715_v60 = vpop.f32.mrb[12].mxu0 }
 0xd40   :  { %v721_v61 = vadd.f32 %v715_v60, %v659_v59  ;;  %v2069_v62 = vpop.f32.mrb[13].mxu0 }
 0xd41   :  { %v718_v63 = vpop.f32.mrb[14].mxu0  ;;  %v2213_v62 = vld [vmem:[#allocation12 + $0x8] sm:$0xff]  }
 0xd42   :  { %2252 = vtanh.f32 %v721_v61  ;;  %v2070_v1 = vpop.f32.mrb[15].mxu0  ;;  %v1918_v3 = vmul.f32 -1.442695, %v721_v61  ;;  %v2212_v61 = vld [vmem:[#allocation12] sm:$0xff]  }
 0xd44   :  { %2254 = vpow2.f32 %v1918_v3 }
 0xd4c   :  { %v2253_v2 = vpop.eup %2252 }
 0xd4d   :  { %731 = vrot.lane.b32.xlu1 %v2253_v2, %s2591_s1 }
 0xd4e   :  { %v2255_v4 = vpop.eup %2254 }
 0xd4f   :  { %v725_v5 = vadd.f32 1.0, %v2255_v4 }
 0xd51   :  { %2256 = vrcp.f32 %v725_v5  ;;  %v944_v5 = vld [vmem:[#allocation2 + $0xe] sm:$0x3] }
 0xd5b   :  { %v2257_v6 = vpop.eup %2256 }
 0xd5c   :  { %v729_v9 = vmul.f32 %v2257_v6, %v644_v51 }
 0xdbf   :  { %v732_v7 = vpop.permute.xlu1 %731 }
 0xdc0   :  { %v734_v8 = vmul.f32 %v2257_v6, %v732_v7 }
 0xdc2   :  { %736 = vrot.lane.b32.xlu0 %v734_v8, %s2586_s30 }
 0xe34   :  { %v737_v10 = vpop.permute.xlu0 %736 }
 0xe35   :  { %v739_v12 = vadd.f32 %v737_v10, %v729_v9 }
 0xe37   :  { %2258 = vtanh.f32 %v739_v12 }
 0xe41   :  { %v2259_v15 = vpop.eup %2258 }
 0xe42   :  { %742 = vrot.lane.b32.xlu1 %v2259_v15, %s2591_s1 }
 0xeb4   :  { %v743_v16 = vpop.permute.xlu1 %742 }
 0xeb5   :  { %v745_v17 = vmul.f32 %v2257_v6, %v743_v16 }
 0xeb7   :  { %v2880_v18 = vpack.c.bf16 %v745_v17, %v745_v17 }
 0xeb9   :  { %759 = vrot.lane.b32.xlu0 %v2880_v18, %s2586_s30 }
 0xf2b   :  { %v760_v19 = vpop.permute.xlu0 %759 }
 0xf2c   :  { %2076 = vmatmul.mubr.msk.bf16.vlgmr.msra.gmra.mrb[12].mxu1 %vm230_vm2, %v760_v19 }
 0xf2d   :  { %2091 = vmatprep.mubr.msk.bf16.mxu1 %vm2596_vm0, %v2595_v0  ;;  %2088 = vmatpush3.bf16.msra.mxu1 %v2212_v61 }
 0xf2e   :  { %2089 = vmatprep.subr.bf16.mxu1 %v2595_v0 }
 0xf31   :  { %2090 = vmatpush3.bf16.msra.mxu1 %v2213_v62 }
 0xf32   :  { %2103 = vmatprep.subr.bf16.mxu1 %v2595_v0 }
 0xfff   :  { %v810_v21 = vpop.f32.mrb[12].mxu1 }
0x1000   :  { %v816_v22 = vadd.f32 %v810_v21, %v754_v20  ;;  %v2077_v23 = vpop.f32.mrb[13].mxu1  ;;  %v463_v20 = vrot.slane %v2844_v11, 7  ;;  %v653_v21 = vrot.slane %v2868_v57, 5 }
0x1001   :  { %v813_v24 = vpop.f32.mrb[14].mxu1 }
0x1002   :  { %2260 = vtanh.f32 %v816_v22  ;;  %v2078_v25 = vpop.f32.mrb[15].mxu1  ;;  %v1922_v27 = vmul.f32 -1.442695, %v816_v22 }
0x1004   :  { %2262 = vpow2.f32 %v1922_v27 }
0x100c   :  { %v2261_v26 = vpop.eup %2260 }
0x100d   :  { %826 = vrot.lane.b32.xlu1 %v2261_v26, %s2591_s1 }
0x100e   :  { %v2263_v28 = vpop.eup %2262 }
0x100f   :  { %v820_v29 = vadd.f32 1.0, %v2263_v28  ;;  %v558_v28 = vrot.slane %v2856_v34, 6 }
0x1011   :  { %2264 = vrcp.f32 %v820_v29  ;;  %v748_v29 = vrot.slane %v2880_v18, 4  ;;  %v2934_v18 = vld [vmem:[#allocation15] sm:$0xff]  }
0x101b   :  { %v2265_v30 = vpop.eup %2264 }
0x101c   :  { %v824_v33 = vmul.f32 %v2265_v30, %v739_v12 }
0x107f   :  { %v827_v31 = vpop.permute.xlu1 %826 }
0x1080   :  { %v829_v32 = vmul.f32 %v2265_v30, %v827_v31  ;;  %v2214_v31 = vld [vmem:[%s3099_s8] sm:$0xff]  }
0x1082   :  { %831 = vrot.lane.b32.xlu0 %v829_v32, %s2586_s30  ;;  %v2215_v32 = vld [vmem:[%s3099_s8 + $0x8] sm:$0xff]  }
0x10f4   :  { %v832_v35 = vpop.permute.xlu0 %831 }
0x10f5   :  { %v834_v36 = vadd.f32 %v832_v35, %v824_v33 }
0x10f7   :  { %2266 = vtanh.f32 %v834_v36 }
0x1101   :  { %v2267_v39 = vpop.eup %2266 }
0x1102   :  { %837 = vrot.lane.b32.xlu1 %v2267_v39, %s2591_s1 }
0x1174   :  { %v838_v40 = vpop.permute.xlu1 %837 }
0x1175   :  { %v840_v41 = vmul.f32 %v2265_v30, %v838_v40  ;;  %v1125_v40 = vpack.c.bf16 %v1121_v37, %v1121_v37 }
0x1177   :  { %v2892_v42 = vpack.c.bf16 %v840_v41, %v840_v41 }
0x1179   :  { %854 = vrot.lane.b32.xlu0 %v2892_v42, %s2586_s30  ;;  %v843_v22 = vrot.slane %v2892_v42, 3  ;;  %v1123_v42 = vld [vmem:[#allocation7 + $0x2] sm:$0x3] }
0x11eb   :  { %v855_v43 = vpop.permute.xlu0 %854 }
0x11ec   :  { %2084 = vmatmul.mubr.msk.bf16.vlgmr.msra.gmra.mrb[16].mxu0 %vm230_vm2, %v855_v43 }
0x11ed   :  { %2099 = vmatprep.mubr.msk.bf16.mxu0 %vm2596_vm0, %v2595_v0  ;;  %2096 = vmatpush3.bf16.msra.mxu0 %v2214_v31 }
0x11ee   :  { %2097 = vmatprep.subr.bf16.mxu0 %v2595_v0 }
0x11f1   :  { %2098 = vmatpush3.bf16.msra.mxu0 %v2215_v32 }
0x11f2   :  { %2111 = vmatprep.subr.bf16.mxu0 %v2595_v0 }
0x12bf   :  { %v905_v45 = vpop.f32.mrb[16].mxu0 }
0x12c0   :  { %v911_v46 = vadd.f32 %v905_v45, %v849_v44  ;;  %v2085_v47 = vpop.f32.mrb[17].mxu0 }
0x12c1   :  { %v908_v48 = vpop.f32.mrb[18].mxu0 }
0x12c2   :  { %2268 = vtanh.f32 %v911_v46  ;;  %v2086_v49 = vpop.f32.mrb[19].mxu0  ;;  %v1926_v51 = vmul.f32 -1.442695, %v911_v46 }
0x12c4   :  { %2270 = vpow2.f32 %v1926_v51 }
0x12cc   :  { %v2269_v50 = vpop.eup %2268 }
0x12cd   :  { %921 = vrot.lane.b32.xlu1 %v2269_v50, %s2591_s1  ;;  %v1931_v50 = vld [vmem:[%s3101_s10] ss:$0 sm:$0xff] }
0x12ce   :  { %v2271_v52 = vpop.eup %2270 }
0x12cf   :  { %v915_v53 = vadd.f32 1.0, %v2271_v52 }
0x12d1   :  { %2272 = vrcp.f32 %v915_v53 }
0x12db   :  { %v2273_v54 = vpop.eup %2272 }
0x12dc   :  { %v919_v58 = vmul.f32 %v2273_v54, %v834_v36  ;;  %v2940_v36 = vld [vmem:[#allocation15 + $0x8] sm:$0xff]  }
0x133f   :  { %v922_v55 = vpop.permute.xlu1 %921 }
0x1340   :  { %v924_v56 = vmul.f32 %v2273_v54, %v922_v55 }
0x1342   :  { %926 = vrot.lane.b32.xlu0 %v924_v56, %s2586_s30 }
0x13b4   :  { %v927_v59 = vpop.permute.xlu0 %926 }
0x13b5   :  { %v929_v60 = vadd.f32 %v927_v59, %v919_v58 }
0x13b7   :  { %2274 = vtanh.f32 %v929_v60 }
0x13c1   :  { %v2275_v63 = vpop.eup %2274 }
0x13c2   :  { %932 = vrot.lane.b32.xlu1 %v2275_v63, %s2591_s1 }
0x1434   :  { %v933_v1 = vpop.permute.xlu1 %932 }
0x1435   :  { %v935_v2 = vmul.f32 %v2273_v54, %v933_v1 }
0x1437   :  { %v936_v3 = vpack.c.bf16 %v935_v2, %v935_v2 }
0x1439   :  { %949 = vrot.lane.b32.xlu0 %v936_v3, %s2586_s30  ;;  %v938_v30 = vrot.slane %v936_v3, 2 }
0x14ab   :  { %v950_v4 = vpop.permute.xlu0 %949 }
0x14ac   :  { %2092 = vmatmul.mubr.msk.bf16.vlgmr.msra.gmra.mrb[16].mxu1 %vm230_vm2, %v950_v4 }
0x14ad   :  { %2107 = vmatprep.mubr.msk.bf16.mxu1 %vm2596_vm0, %v2595_v0  ;;  %2104 = vmatpush3.bf16.msra.mxu1 %v2934_v18 }
0x14ae   :  { %2105 = vmatprep.subr.bf16.mxu1 %v2595_v0 }
0x14b1   :  { %2106 = vmatpush3.bf16.msra.mxu1 %v2940_v36 }
0x14b2   :  { %2119 = vmatprep.subr.bf16.mxu1 %v2595_v0 }
0x14b4   :  { %2108 = vmatmul.mubr.msk.bf16.vlgmr.msra.gmra.mrb[20].mxu1 %vm230_vm2, %v1125_v40 }
0x14b5   :  { %2120 = vmatpush3.bf16.msra.mxu1 %v2934_v18  ;;  %2123 = vmatprep.mubr.msk.bf16.mxu1 %vm2596_vm0, %v2595_v0 }
0x14b6   :  { %2121 = vmatprep.subr.bf16.mxu1 %v2595_v0 }
0x14b9   :  { %2122 = vmatpush3.bf16.msra.mxu1 %v2940_v36 }
0x14ba   :  { %2135 = vmatprep.subr.bf16.mxu1 %v2595_v0 }
0x157f   :  { %v1000_v6 = vpop.f32.mrb[16].mxu1 }
0x1580   :  { %v1006_v7 = vadd.f32 %v1000_v6, %v944_v5  ;;  %v2093_v8 = vpop.f32.mrb[17].mxu1 }
0x1581   :  { %v1003_v9 = vpop.f32.mrb[18].mxu1 }
0x1582   :  { %2276 = vtanh.f32 %v1006_v7  ;;  %v2094_v10 = vpop.f32.mrb[19].mxu1  ;;  %v1930_v13 = vmul.f32 -1.442695, %v1006_v7 }
0x1584   :  { %2278 = vpow2.f32 %v1930_v13 }
0x1587   :  { %v1179_v46 = vpop.f32.mrb[20].mxu1 }
0x1588   :  { %v2109_v47 = vpop.f32.mrb[21].mxu1 }
0x1589   :  { %v1182_v48 = vpop.f32.mrb[22].mxu1 }
0x158a   :  { %v2110_v49 = vpop.f32.mrb[23].mxu1 }
0x158c   :  { %v2277_v12 = vpop.eup %2276 }
0x158d   :  { %1016 = vrot.lane.b32.xlu1 %v2277_v12, %s2591_s1 }
0x158e   :  { %v2279_v14 = vpop.eup %2278 }
0x158f   :  { %v1010_v15 = vadd.f32 1.0, %v2279_v14 }
0x1591   :  { %2280 = vrcp.f32 %v1010_v15 }
0x159b   :  { %v2281_v16 = vpop.eup %2280 }
0x159c   :  { %v1014_v23 = vmul.f32 %v2281_v16, %v929_v60 }
0x15ff   :  { %v1017_v17 = vpop.permute.xlu1 %1016 }
0x1600   :  { %v1019_v19 = vmul.f32 %v2281_v16, %v1017_v17 }
0x1602   :  { %1021 = vrot.lane.b32.xlu0 %v1019_v19, %s2586_s30 }
0x1606   :  { %464 = vrot.lane.b32.xlu0 %v463_v20, %s2586_s30 }
0x160a   :  { %654 = vrot.lane.b32.xlu0 %v653_v21, %s2586_s30 }
0x160e   :  { %844 = vrot.lane.b32.xlu0 %v843_v22, %s2586_s30 }
0x1674   :  { %v1022_v24 = vpop.permute.xlu0 %1021 }
0x1675   :  { %v2916_v25 = vadd.f32 %v1022_v24, %v1014_v23 }
0x1677   :  { %2282 = vtanh.f32 %v2916_v25 }
0x1678   :  { %v465_v26 = vpop.permute.xlu0 %464 }
0x1679   :  { %468 = vst.msk [vmem:[#allocation3] sm:$0x2] %vm467_vm4, %v465_v26 }
0x167c   :  { %v655_v11 = vpop.permute.xlu0 %654 }
0x167d   :  { %658 = vst.msk [vmem:[#allocation3] sm:$0x8] %vm657_vm5, %v655_v11 }
0x1680   :  { %v845_v57 = vpop.permute.xlu0 %844 }
0x1681   :  { %v2283_v27 = vpop.eup %2282  ;;  %848 = vst.msk [vmem:[#allocation3] sm:$0x20] %vm847_vm6, %v845_v57 }
0x1682   :  { %1027 = vrot.lane.b32.xlu1 %v2283_v27, %s2591_s1 }
0x1686   :  { %559 = vrot.lane.b32.xlu1 %v558_v28, %s2586_s30 }
0x168a   :  { %749 = vrot.lane.b32.xlu1 %v748_v29, %s2586_s30 }
0x168e   :  { %939 = vrot.lane.b32.xlu1 %v938_v30, %s2586_s30 }
0x16f4   :  { %v1028_v34 = vpop.permute.xlu1 %1027 }
0x16f5   :  { %v2932_v33 = vmul.f32 %v2281_v16, %v1028_v34 }
0x16f7   :  { %v1031_v35 = vpack.c.bf16 %v2932_v33, %v2932_v33 }
0x16f8   :  { %v560_v38 = vpop.permute.xlu1 %559 }
0x16f9   :  { %563 = vst.msk [vmem:[#allocation3] sm:$0x4] %vm562_vm7, %v560_v38  ;;  %v1033_v39 = vrot.slane %v1031_v35, 1 }
0x16fb   :  { %1034 = vrot.lane.b32.xlu0 %v1033_v39, %s2586_s30 }
0x16fc   :  { %v750_v41 = vpop.permute.xlu1 %749 }
0x16fd   :  { %753 = vst.msk [vmem:[#allocation3] sm:$0x10] %vm752_vm8, %v750_v41 }
0x16ff   :  { %1194 = vrot.lane.b32.xlu0 %v1123_v42, %s2586_s30 }
0x1700   :  { %v940_v43 = vpop.permute.xlu1 %939 }
0x1701   :  { %943 = vst.msk [vmem:[#allocation3] sm:$0x40] %vm942_vm9, %v940_v43 }
0x176d   :  { %v1035_v44 = vpop.permute.xlu0 %1034 }
0x176e   :  { %1038 = vst.msk [vmem:[#allocation3] sm:$0x80] %vm1037_vm10, %v1035_v44 }
0x1771   :  { %v1195_v4 = vpop.permute.xlu0 %1194 }
0x1775   :  { %v1050_v45 = vld [vmem:[#allocation3] sm:$0xff] }
0x1776   :  { %2100 = vmatmul.mubr.msk.bf16.vlgmr.msra.gmra.mrb[20].mxu0 %vm230_vm2, %v1050_v45 }
0x1777   :  { %2112 = vmatpush3.bf16.msra.mxu0 %v2934_v18  ;;  %2115 = vmatprep.mubr.msk.bf16.mxu0 %vm2596_vm0, %v2595_v0 }
0x1778   :  { %2113 = vmatprep.subr.bf16.mxu0 %v2595_v0 }
0x177b   :  { %2114 = vmatpush3.bf16.msra.mxu0 %v2940_v36 }
0x177c   :  { %2127 = vmatprep.subr.bf16.mxu0 %v2595_v0 }
0x1849   :  { %v1111_v51 = vpop.f32.mrb[20].mxu0 }
0x184a   :  { %v1112_v52 = vadd.f32 %v1931_v50, %v1111_v51  ;;  %v2101_v53 = vpop.f32.mrb[21].mxu0 }
0x184b   :  { %v1114_v54 = vpop.f32.mrb[22].mxu0 }
0x184c   :  { %1118 = vst [vmem:[#allocation2] sm:$0xff] %v1112_v52  ;;  %v1115_v55 = vadd.f32 %v1931_v50, %v1114_v54  ;;  %v2102_v56 = vpop.f32.mrb[23].mxu0 }
0x184e   :  { %1119 = vst [vmem:[#allocation2 + $0x8] sm:$0xff] %v1115_v55 }
0x1853   :  { %v1124_v58 = vld [vmem:[#allocation2] sm:$0x3]  ;;  %v1214_v14 = vld [vmem:[#allocation2 + $0x2] sm:$0x3]  ;;  %v1287_v37 = vld [vmem:[#allocation2 + $0x4] sm:$0x3] }
0x1854   :  { %v1185_v59 = vadd.f32 %v1179_v46, %v1124_v58 }
0x1856   :  { %2284 = vtanh.f32 %v1185_v59  ;;  %v1938_v61 = vmul.f32 -1.442695, %v1185_v59  ;;  %v1360_v59 = vld [vmem:[#allocation2 + $0x6] sm:$0x3] }
0x1858   :  { %2286 = vpow2.f32 %v1938_v61 }
0x1860   :  { %v2285_v60 = vpop.eup %2284 }
0x1861   :  { %1199 = vrot.lane.b32.xlu1 %v2285_v60, %s2591_s1 }
0x1862   :  { %v2287_v62 = vpop.eup %2286 }
0x1863   :  { %v1189_v63 = vadd.f32 1.0, %v2287_v62 }
0x1865   :  { %2288 = vrcp.f32 %v1189_v63 }
0x186f   :  { %v2289_v1 = vpop.eup %2288 }
0x1870   :  { %v1197_v5 = vmul.f32 %v2289_v1, %v1195_v4 }
0x18d3   :  { %v1200_v2 = vpop.permute.xlu1 %1199 }
0x18d4   :  { %v1202_v3 = vmul.f32 %v2289_v1, %v1200_v2 }
0x18d6   :  { %1204 = vrot.lane.b32.xlu1 %v1202_v3, %s2586_s30 }
0x1948   :  { %v1205_v6 = vpop.permute.xlu1 %1204 }
0x1949   :  { %v1207_v7 = vadd.f32 %v1205_v6, %v1197_v5 }
0x194b   :  { %2290 = vtanh.f32 %v1207_v7 }
0x1955   :  { %v2291_v8 = vpop.eup %2290 }
0x1956   :  { %1210 = vrot.lane.b32.xlu0 %v2291_v8, %s2591_s1 }
0x19c8   :  { %v1211_v9 = vpop.permute.xlu0 %1210 }
0x19c9   :  { %v1213_v10 = vmul.f32 %v2289_v1, %v1211_v9 }
0x19cb   :  { %v1215_v12 = vpack.c.bf16 %v1213_v10, %v1213_v10 }
0x19cd   :  { %1217 = vrot.lane.b32.xlu1 %v1215_v12, %s2586_s30 }
0x1a3f   :  { %v1218_v13 = vpop.permute.xlu1 %1217 }
0x1a40   :  { %2116 = vmatmul.mubr.msk.bf16.vlgmr.msra.gmra.mrb[24].mxu0 %vm230_vm2, %v1218_v13 }
0x1a41   :  { %2128 = vmatpush3.bf16.msra.mxu0 %v2934_v18  ;;  %2131 = vmatprep.mubr.msk.bf16.mxu0 %vm2596_vm0, %v2595_v0 }
0x1a42   :  { %2129 = vmatprep.subr.bf16.mxu0 %v2595_v0 }
0x1a45   :  { %2130 = vmatpush3.bf16.msra.mxu0 %v2940_v36 }
0x1a46   :  { %2143 = vmatprep.subr.bf16.mxu0 %v2595_v0 }
0x1b13   :  { %v1256_v15 = vpop.f32.mrb[24].mxu0 }
0x1b14   :  { %v1262_v16 = vadd.f32 %v1256_v15, %v1214_v14  ;;  %v2117_v17 = vpop.f32.mrb[25].mxu0 }
0x1b15   :  { %v1259_v19 = vpop.f32.mrb[26].mxu0 }
0x1b16   :  { %2292 = vtanh.f32 %v1262_v16  ;;  %v2118_v20 = vpop.f32.mrb[27].mxu0  ;;  %v1940_v22 = vmul.f32 -1.442695, %v1262_v16  ;;  %v1433_v19 = vld [vmem:[#allocation2 + $0x8] sm:$0x3] }
0x1b18   :  { %2294 = vpow2.f32 %v1940_v22 }
0x1b20   :  { %v2293_v21 = vpop.eup %2292 }
0x1b21   :  { %1272 = vrot.lane.b32.xlu0 %v2293_v21, %s2591_s1 }
0x1b22   :  { %v2295_v23 = vpop.eup %2294 }
0x1b23   :  { %v1266_v24 = vadd.f32 1.0, %v2295_v23 }
0x1b25   :  { %2296 = vrcp.f32 %v1266_v24 }
0x1b2f   :  { %v2297_v26 = vpop.eup %2296 }
0x1b30   :  { %v1270_v27 = vmul.f32 %v2297_v26, %v1207_v7 }
0x1b93   :  { %v1273_v11 = vpop.permute.xlu0 %1272 }
0x1b94   :  { %v1275_v57 = vmul.f32 %v2297_v26, %v1273_v11 }
0x1b96   :  { %1277 = vrot.lane.b32.xlu1 %v1275_v57, %s2586_s30 }
0x1c08   :  { %v1278_v28 = vpop.permute.xlu1 %1277 }
0x1c09   :  { %v1280_v29 = vadd.f32 %v1278_v28, %v1270_v27 }
0x1c0b   :  { %2298 = vtanh.f32 %v1280_v29 }
0x1c15   :  { %v2299_v30 = vpop.eup %2298 }
0x1c16   :  { %1283 = vrot.lane.b32.xlu0 %v2299_v30, %s2591_s1 }
0x1c88   :  { %v1284_v31 = vpop.permute.xlu0 %1283 }
0x1c89   :  { %v1286_v32 = vmul.f32 %v2297_v26, %v1284_v31 }
0x1c8b   :  { %v1288_v34 = vpack.c.bf16 %v1286_v32, %v1286_v32 }
0x1c8d   :  { %1290 = vrot.lane.b32.xlu1 %v1288_v34, %s2586_s30 }
0x1cff   :  { %v1291_v35 = vpop.permute.xlu1 %1290 }
0x1d00   :  { %2124 = vmatmul.mubr.msk.bf16.vlgmr.msra.gmra.mrb[24].mxu1 %vm230_vm2, %v1291_v35 }
0x1d01   :  { %2136 = vmatpush3.bf16.msra.mxu1 %v2934_v18  ;;  %2139 = vmatprep.mubr.msk.bf16.mxu1 %vm2596_vm0, %v2595_v0 }
0x1d02   :  { %2137 = vmatprep.subr.bf16.mxu1 %v2595_v0 }
0x1d05   :  { %2138 = vmatpush3.bf16.msra.mxu1 %v2940_v36 }
0x1d06   :  { %2151 = vmatprep.subr.bf16.mxu1 %v2595_v0 }
0x1dd3   :  { %v1329_v38 = vpop.f32.mrb[24].mxu1 }
0x1dd4   :  { %v1335_v39 = vadd.f32 %v1329_v38, %v1287_v37  ;;  %v2125_v40 = vpop.f32.mrb[25].mxu1 }
0x1dd5   :  { %v1332_v41 = vpop.f32.mrb[26].mxu1 }
0x1dd6   :  { %2300 = vtanh.f32 %v1335_v39  ;;  %v2126_v42 = vpop.f32.mrb[27].mxu1  ;;  %v1942_v44 = vmul.f32 -1.442695, %v1335_v39  ;;  %v1506_v41 = vld [vmem:[#allocation2 + $0xa] sm:$0x3] }
0x1dd8   :  { %2302 = vpow2.f32 %v1942_v44 }
0x1de0   :  { %v2301_v43 = vpop.eup %2300 }
0x1de1   :  { %1345 = vrot.lane.b32.xlu0 %v2301_v43, %s2591_s1 }
0x1de2   :  { %v2303_v45 = vpop.eup %2302 }
0x1de3   :  { %v1339_v46 = vadd.f32 1.0, %v2303_v45 }
0x1de5   :  { %2304 = vrcp.f32 %v1339_v46 }
0x1def   :  { %v2305_v47 = vpop.eup %2304 }
0x1df0   :  { %v1343_v50 = vmul.f32 %v2305_v47, %v1280_v29 }
0x1e53   :  { %v1346_v48 = vpop.permute.xlu0 %1345 }
0x1e54   :  { %v1348_v49 = vmul.f32 %v2305_v47, %v1346_v48 }
0x1e56   :  { %1350 = vrot.lane.b32.xlu1 %v1348_v49, %s2586_s30 }
0x1ec8   :  { %v1351_v51 = vpop.permute.xlu1 %1350 }
0x1ec9   :  { %v1353_v52 = vadd.f32 %v1351_v51, %v1343_v50 }
0x1ecb   :  { %2306 = vtanh.f32 %v1353_v52 }
0x1ed5   :  { %v2307_v53 = vpop.eup %2306 }
0x1ed6   :  { %1356 = vrot.lane.b32.xlu0 %v2307_v53, %s2591_s1 }
0x1f48   :  { %v1357_v54 = vpop.permute.xlu0 %1356 }
0x1f49   :  { %v1359_v55 = vmul.f32 %v2305_v47, %v1357_v54 }
0x1f4b   :  { %v1361_v56 = vpack.c.bf16 %v1359_v55, %v1359_v55 }
0x1f4d   :  { %1363 = vrot.lane.b32.xlu1 %v1361_v56, %s2586_s30 }
0x1fbf   :  { %v1364_v58 = vpop.permute.xlu1 %1363 }
0x1fc0   :  { %2132 = vmatmul.mubr.msk.bf16.vlgmr.msra.gmra.mrb[28].mxu0 %vm230_vm2, %v1364_v58 }
0x1fc1   :  { %2144 = vmatpush3.bf16.msra.mxu0 %v2934_v18  ;;  %2147 = vmatprep.mubr.msk.bf16.mxu0 %vm2596_vm0, %v2595_v0 }
0x1fc2   :  { %2145 = vmatprep.subr.bf16.mxu0 %v2595_v0 }
0x1fc5   :  { %2146 = vmatpush3.bf16.msra.mxu0 %v2940_v36 }
0x1fc6   :  { %2159 = vmatprep.subr.bf16.mxu0 %v2595_v0 }
0x2093   :  { %v1402_v60 = vpop.f32.mrb[28].mxu0 }
0x2094   :  { %v1408_v61 = vadd.f32 %v1402_v60, %v1360_v59  ;;  %v2133_v62 = vpop.f32.mrb[29].mxu0 }
0x2095   :  { %v1405_v63 = vpop.f32.mrb[30].mxu0 }
0x2096   :  { %2308 = vtanh.f32 %v1408_v61  ;;  %v2134_v1 = vpop.f32.mrb[31].mxu0  ;;  %v1944_v3 = vmul.f32 -1.442695, %v1408_v61  ;;  %v1579_v61 = vld [vmem:[#allocation2 + $0xc] sm:$0x3] }
0x2098   :  { %2310 = vpow2.f32 %v1944_v3 }
0x20a0   :  { %v2309_v2 = vpop.eup %2308 }
0x20a1   :  { %1418 = vrot.lane.b32.xlu0 %v2309_v2, %s2591_s1 }
0x20a2   :  { %v2311_v4 = vpop.eup %2310 }
0x20a3   :  { %v1412_v5 = vadd.f32 1.0, %v2311_v4 }
0x20a5   :  { %2312 = vrcp.f32 %v1412_v5 }
0x20af   :  { %v2313_v6 = vpop.eup %2312 }
0x20b0   :  { %v1416_v9 = vmul.f32 %v2313_v6, %v1353_v52 }
0x2113   :  { %v1419_v7 = vpop.permute.xlu0 %1418 }
0x2114   :  { %v1421_v8 = vmul.f32 %v2313_v6, %v1419_v7 }
0x2116   :  { %1423 = vrot.lane.b32.xlu1 %v1421_v8, %s2586_s30 }
0x2188   :  { %v1424_v10 = vpop.permute.xlu1 %1423 }
0x2189   :  { %v1426_v12 = vadd.f32 %v1424_v10, %v1416_v9 }
0x218b   :  { %2314 = vtanh.f32 %v1426_v12 }
0x2195   :  { %v2315_v13 = vpop.eup %2314 }
0x2196   :  { %1429 = vrot.lane.b32.xlu0 %v2315_v13, %s2591_s1 }
0x2208   :  { %v1430_v14 = vpop.permute.xlu0 %1429 }
0x2209   :  { %v1432_v15 = vmul.f32 %v2313_v6, %v1430_v14 }
0x220b   :  { %v1434_v16 = vpack.c.bf16 %v1432_v15, %v1432_v15 }
0x220d   :  { %1436 = vrot.lane.b32.xlu1 %v1434_v16, %s2586_s30 }
0x227f   :  { %v1437_v17 = vpop.permute.xlu1 %1436 }
0x2280   :  { %2140 = vmatmul.mubr.msk.bf16.vlgmr.msra.gmra.mrb[28].mxu1 %vm230_vm2, %v1437_v17 }
0x2281   :  { %2152 = vmatpush3.bf16.msra.mxu1 %v2934_v18  ;;  %2155 = vmatprep.mubr.msk.bf16.mxu1 %vm2596_vm0, %v2595_v0 }
0x2282   :  { %2153 = vmatprep.subr.bf16.mxu1 %v2595_v0 }
0x2285   :  { %2154 = vmatpush3.bf16.msra.mxu1 %v2940_v36 }
0x2286   :  { %2167 = vmatprep.subr.bf16.mxu1 %v2595_v0 }
0x2353   :  { %v1475_v20 = vpop.f32.mrb[28].mxu1 }
0x2354   :  { %v1481_v21 = vadd.f32 %v1475_v20, %v1433_v19  ;;  %v2141_v22 = vpop.f32.mrb[29].mxu1 }
0x2355   :  { %v1478_v23 = vpop.f32.mrb[30].mxu1 }
0x2356   :  { %2316 = vtanh.f32 %v1481_v21  ;;  %v2142_v24 = vpop.f32.mrb[31].mxu1  ;;  %v1946_v11 = vmul.f32 -1.442695, %v1481_v21  ;;  %v1652_v21 = vld [vmem:[#allocation2 + $0xe] sm:$0x3] }
0x2358   :  { %2318 = vpow2.f32 %v1946_v11 }
0x2360   :  { %v2317_v26 = vpop.eup %2316 }
0x2361   :  { %1491 = vrot.lane.b32.xlu0 %v2317_v26, %s2591_s1 }
0x2362   :  { %v2319_v57 = vpop.eup %2318 }
0x2363   :  { %v1485_v27 = vadd.f32 1.0, %v2319_v57 }
0x2365   :  { %2320 = vrcp.f32 %v1485_v27 }
0x236f   :  { %v2321_v28 = vpop.eup %2320 }
0x2370   :  { %v1489_v31 = vmul.f32 %v2321_v28, %v1426_v12 }
0x23d3   :  { %v1492_v29 = vpop.permute.xlu0 %1491 }
0x23d4   :  { %v1494_v30 = vmul.f32 %v2321_v28, %v1492_v29 }
0x23d6   :  { %1496 = vrot.lane.b32.xlu1 %v1494_v30, %s2586_s30 }
0x2448   :  { %v1497_v32 = vpop.permute.xlu1 %1496 }
0x2449   :  { %v1499_v34 = vadd.f32 %v1497_v32, %v1489_v31 }
0x244b   :  { %2322 = vtanh.f32 %v1499_v34 }
0x2455   :  { %v2323_v35 = vpop.eup %2322 }
0x2456   :  { %1502 = vrot.lane.b32.xlu0 %v2323_v35, %s2591_s1 }
0x24c8   :  { %v1503_v37 = vpop.permute.xlu0 %1502 }
0x24c9   :  { %v1505_v38 = vmul.f32 %v2321_v28, %v1503_v37 }
0x24cb   :  { %v1507_v39 = vpack.c.bf16 %v1505_v38, %v1505_v38 }
0x24cd   :  { %1509 = vrot.lane.b32.xlu1 %v1507_v39, %s2586_s30  ;;  %v2218_v39 = vld [vmem:[%s3102_s11] sm:$0xff]  }
0x253f   :  { %v1510_v40 = vpop.permute.xlu1 %1509 }
0x2540   :  { %2148 = vmatmul.mubr.msk.bf16.vlgmr.msra.gmra.mrb[32].mxu0 %vm230_vm2, %v1510_v40  ;;  %v2219_v40 = vld [vmem:[%s3102_s11 + $0x8] sm:$0xff]   ;;  %s2598_s11 = smov [#allocation17]  }
0x2541   :  { %2160 = vmatpush3.bf16.msra.mxu0 %v2934_v18  ;;  %2163 = vmatprep.mubr.msk.bf16.mxu0 %vm2596_vm0, %v2595_v0 }
0x2542   :  { %2161 = vmatprep.subr.bf16.mxu0 %v2595_v0 }
0x2545   :  { %2162 = vmatpush3.bf16.msra.mxu0 %v2940_v36 }
0x2613   :  { %v1548_v42 = vpop.f32.mrb[32].mxu0 }
0x2614   :  { %v1554_v43 = vadd.f32 %v1548_v42, %v1506_v41  ;;  %v2149_v44 = vpop.f32.mrb[33].mxu0 }
0x2615   :  { %v1551_v45 = vpop.f32.mrb[34].mxu0 }
0x2616   :  { %2324 = vtanh.f32 %v1554_v43  ;;  %v2150_v46 = vpop.f32.mrb[35].mxu0  ;;  %v1948_v48 = vmul.f32 -1.442695, %v1554_v43 }
0x2618   :  { %2326 = vpow2.f32 %v1948_v48 }
0x2620   :  { %v2325_v47 = vpop.eup %2324 }
0x2621   :  { %1564 = vrot.lane.b32.xlu0 %v2325_v47, %s2591_s1 }
0x2622   :  { %v2327_v18 = vpop.eup %2326 }
0x2623   :  { %v1558_v49 = vadd.f32 1.0, %v2327_v18 }
0x2625   :  { %2328 = vrcp.f32 %v1558_v49 }
0x262f   :  { %v2329_v50 = vpop.eup %2328 }
0x2630   :  { %v1562_v36 = vmul.f32 %v2329_v50, %v1499_v34 }
0x2693   :  { %v1565_v51 = vpop.permute.xlu0 %1564 }
0x2694   :  { %v1567_v52 = vmul.f32 %v2329_v50, %v1565_v51 }
0x2696   :  { %1569 = vrot.lane.b32.xlu1 %v1567_v52, %s2586_s30 }
0x2708   :  { %v1570_v53 = vpop.permute.xlu1 %1569 }
0x2709   :  { %v1572_v54 = vadd.f32 %v1570_v53, %v1562_v36 }
0x270b   :  { %2330 = vtanh.f32 %v1572_v54 }
0x2715   :  { %v2331_v55 = vpop.eup %2330 }
0x2716   :  { %1575 = vrot.lane.b32.xlu0 %v2331_v55, %s2591_s1 }
0x2788   :  { %v1576_v56 = vpop.permute.xlu0 %1575 }
0x2789   :  { %v1578_v58 = vmul.f32 %v2329_v50, %v1576_v56 }
0x278b   :  { %v1580_v59 = vpack.c.bf16 %v1578_v58, %v1578_v58 }
0x278d   :  { %1582 = vrot.lane.b32.xlu1 %v1580_v59, %s2586_s30 }
0x27ff   :  { %v1583_v60 = vpop.permute.xlu1 %1582 }
0x2800   :  { %2156 = vmatmul.mubr.msk.bf16.vlgmr.msra.gmra.mrb[32].mxu1 %vm230_vm2, %v1583_v60 }
0x2801   :  { %2171 = vmatprep.mubr.msk.bf16.mxu1 %vm2596_vm0, %v2595_v0  ;;  %2168 = vmatpush3.bf16.msra.mxu1 %v2218_v39 }
0x2802   :  { %2169 = vmatprep.subr.bf16.mxu1 %v2595_v0 }
0x2805   :  { %2170 = vmatpush3.bf16.msra.mxu1 %v2219_v40 }
0x28d3   :  { %v1621_v62 = vpop.f32.mrb[32].mxu1 }
0x28d4   :  { %v1627_v63 = vadd.f32 %v1621_v62, %v1579_v61  ;;  %v2157_v1 = vpop.f32.mrb[33].mxu1 }
0x28d5   :  { %v1624_v2 = vpop.f32.mrb[34].mxu1 }
0x28d6   :  { %2332 = vtanh.f32 %v1627_v63  ;;  %v2158_v3 = vpop.f32.mrb[35].mxu1  ;;  %v1950_v5 = vmul.f32 -1.442695, %v1627_v63 }
0x28d8   :  { %2334 = vpow2.f32 %v1950_v5 }
0x28e0   :  { %v2333_v4 = vpop.eup %2332 }
0x28e1   :  { %1637 = vrot.lane.b32.xlu0 %v2333_v4, %s2591_s1 }
0x28e2   :  { %v2335_v6 = vpop.eup %2334 }
0x28e3   :  { %v1631_v7 = vadd.f32 1.0, %v2335_v6 }
0x28e5   :  { %2336 = vrcp.f32 %v1631_v7 }
0x28ef   :  { %v2337_v8 = vpop.eup %2336 }
0x28f0   :  { %v1635_v12 = vmul.f32 %v2337_v8, %v1572_v54 }
0x2953   :  { %v1638_v9 = vpop.permute.xlu0 %1637 }
0x2954   :  { %v1640_v10 = vmul.f32 %v2337_v8, %v1638_v9 }
0x2956   :  { %1642 = vrot.lane.b32.xlu1 %v1640_v10, %s2586_s30 }
0x29c8   :  { %v1643_v13 = vpop.permute.xlu1 %1642 }
0x29c9   :  { %v1645_v14 = vadd.f32 %v1643_v13, %v1635_v12 }
0x29cb   :  { %2338 = vtanh.f32 %v1645_v14 }
0x29d5   :  { %v2339_v15 = vpop.eup %2338 }
0x29d6   :  { %1648 = vrot.lane.b32.xlu0 %v2339_v15, %s2591_s1 }
0x2a48   :  { %v1649_v16 = vpop.permute.xlu0 %1648 }
0x2a49   :  { %v1651_v17 = vmul.f32 %v2337_v8, %v1649_v16 }
0x2a4b   :  { %v1653_v19 = vpack.c.bf16 %v1651_v17, %v1651_v17 }
0x2a4d   :  { %1655 = vrot.lane.b32.xlu1 %v1653_v19, %s2586_s30 }
0x2abf   :  { %v1656_v20 = vpop.permute.xlu1 %1655 }
0x2ac0   :  { %2164 = vmatmul.mubr.msk.bf16.vlgmr.msra.gmra.mrb[36].mxu0 %vm230_vm2, %v1656_v20 }
0x2b93   :  { %v1694_v22 = vpop.f32.mrb[36].mxu0 }
0x2b94   :  { %v1700_v23 = vadd.f32 %v1694_v22, %v1652_v21  ;;  %v2165_v24 = vpop.f32.mrb[37].mxu0 }
0x2b95   :  { %v1697_v26 = vpop.f32.mrb[38].mxu0 }
0x2b96   :  { %2340 = vtanh.f32 %v1700_v23  ;;  %v2166_v11 = vpop.f32.mrb[39].mxu0  ;;  %v1952_v27 = vmul.f32 -1.442695, %v1700_v23 }
0x2b98   :  { %2342 = vpow2.f32 %v1952_v27 }
0x2ba0   :  { %v2341_v57 = vpop.eup %2340 }
0x2ba1   :  { %1710 = vrot.lane.b32.xlu0 %v2341_v57, %s2591_s1 }
0x2ba2   :  { %v2343_v28 = vpop.eup %2342 }
0x2ba3   :  { %v1704_v29 = vadd.f32 1.0, %v2343_v28 }
0x2ba5   :  { %2344 = vrcp.f32 %v1704_v29 }
0x2baf   :  { %v2345_v30 = vpop.eup %2344 }
0x2bb0   :  { %v1708_v34 = vmul.f32 %v2345_v30, %v1645_v14 }
0x2c13   :  { %v1711_v31 = vpop.permute.xlu0 %1710 }
0x2c14   :  { %v1713_v32 = vmul.f32 %v2345_v30, %v1711_v31 }
0x2c16   :  { %1715 = vrot.lane.b32.xlu1 %v1713_v32, %s2586_s30 }
0x2c88   :  { %v1716_v35 = vpop.permute.xlu1 %1715 }
0x2c89   :  { %v1718_v37 = vadd.f32 %v1716_v35, %v1708_v34 }
0x2c8b   :  { %2346 = vtanh.f32 %v1718_v37 }
0x2c95   :  { %v2347_v38 = vpop.eup %2346 }
0x2c96   :  { %1721 = vrot.lane.b32.xlu0 %v2347_v38, %s2591_s1  ;;  %s1858_s1 = sshll.u32 %s2598_s11, 4  ;;  %s1859_s1 = int_to_ptr.vmem [resolvable:$true] %s1858_s1 }
0x2c97   :  { %s2506_s29 = scalar_lea.vmem %s1859_s1, 64  ;;  %p2511_p1 = scmp.lt.s32.totalorder %s1859_s1, %s1859_s1 }
0x2c98   :  { %p2507_p0 = scmp.ne.s32.totalorder %s1859_s1, %s2506_s29  ;;  %p2512_p2 = scmp.lt.s32.totalorder %s2506_s29, %s2506_s29 }
0x2c9a   :  { %1040 = vrot.lane.b32.xlu0 %v2932_v33, %s2586_s30  ;;  %p2513_p3 = por %p2512_p2, %p2511_p1 }
0x2c9c   :  { %p2514_p4 = pnand %p2513_p3, %p2507_p0 }
0x2c9e   :  { %1046 = vrot.lane.b32.xlu0 %v2916_v25, %s2597_s19 }
0x2d08   :  { %v1722_v41 = vpop.permute.xlu0 %1721 }
0x2d09   :  { %v1724_v42 = vmul.f32 %v2345_v30, %v1722_v41 }
0x2d0b   :  { %v1737_v43 = vpack.c.bf16 %v1724_v42, %v1724_v42 }
0x2d0c   :  { %v1041_v44 = vpop.permute.xlu0 %1040 }
0x2d0d   :  { %1044 = vst.msk [vmem:[#allocation17] sm:$0x3] %vm1043_vm11, %v1041_v44  ;;  %1750 = vrot.lane.b32.xlu1 %v1737_v43, %s2586_s30 }
0x2d10   :  { %v1047_v45 = vpop.permute.xlu0 %1046 }
0x2d11   :  { %1049 = vst.msk [vmem:[#allocation19] sm:$0x3] %vm1043_vm11, %v1047_v45  ;;  %1726 = vrot.lane.b32.xlu1 %v1724_v42, %s2586_s30 }
0x2d15   :  { %1732 = vrot.lane.b32.xlu1 %v1718_v37, %s2597_s19 }
0x2d7f   :  { %v1751_v0 = vpop.permute.xlu1 %1750 }
0x2d80   :  { %2172 = vmatmul.mubr.msk.bf16.vlgmr.msra.gmra.mrb[36].mxu1 %vm230_vm2, %v1751_v0 }
0x2d83   :  { %v1727_v33 = vpop.permute.xlu1 %1726 }
0x2d84   :  { %1730 = vst.msk [vmem:[#allocation17 + $0x2] sm:$0x3] %vm1043_vm11, %v1727_v33 }
0x2d87   :  { %v1733_v46 = vpop.permute.xlu1 %1732 }
0x2d88   :  { %1736 = vst.msk [vmem:[#allocation19 + $0x2] sm:$0x3] %vm1043_vm11, %v1733_v46 }
0x2d89   :  { %2517 = shalt.err (!%p2514_p4)
}
0x2d8a   :  { %s2518_s7 = scalar_lea.hbm %s3105_s14, 64 }
0x2d8b   :  { %p2519_p5 = scmp.ne.s32.totalorder %s3105_s14, %s2518_s7  ;;  %p2522_p6 = scmp.lt.u32.totalorder %s2518_s7, %s3105_s14 }
0x2d8d   :  { %p2524_p7 = pnand %p2522_p6, %p2519_p5 }
0x2d8f   :  { %2527 = shalt.err (!%p2524_p7)
}
0x2d90   :  { %1864 = dma.vmem_to_hbm [thread:$0]  %s1859_s1, 64, %s3105_s14, [#allocation18], %s2586_s30, %s2586_s30, %s2587_s16  }
0x2d91   :  { %s2599_s3 = smov [#allocation19]  }
0x2d92   :  { %s1870_s4 = sshll.u32 %s2599_s3, 4  ;;  %s1871_s4 = int_to_ptr.vmem [resolvable:$true] %s1870_s4 }
0x2d93   :  { %s2528_s0 = scalar_lea.vmem %s1871_s4, 64  ;;  %p2533_p9 = scmp.lt.s32.totalorder %s1871_s4, %s1871_s4 }
0x2d94   :  { %p2529_p8 = scmp.ne.s32.totalorder %s1871_s4, %s2528_s0  ;;  %p2534_p10 = scmp.lt.s32.totalorder %s2528_s0, %s2528_s0 }
0x2d96   :  { %p2535_p11 = por %p2534_p10, %p2533_p9 }
0x2d98   :  { %p2536_p12 = pnand %p2535_p11, %p2529_p8 }
0x2d9a   :  { %2539 = shalt.err (!%p2536_p12)
}
0x2d9b   :  { %s2540_s26 = scalar_lea.hbm %s3106_s15, 64 }
0x2d9c   :  { %p2541_p13 = scmp.ne.s32.totalorder %s3106_s15, %s2540_s26  ;;  %p2544_p0 = scmp.lt.u32.totalorder %s2540_s26, %s3106_s15 }
0x2d9e   :  { %p2546_p1 = pnand %p2544_p0, %p2541_p13 }
0x2da0   :  { %2549 = shalt.err (!%p2546_p1)
}
0x2da1   :  { %1876 = dma.vmem_to_hbm [thread:$0]  %s1871_s4, 64, %s3106_s15, [#allocation18], %s2586_s30, %s2586_s30, %s2587_s16   ;;  %v2600_v53 = vmov 1966171168   ;;  %v1817_v55 = vlaneseq  ;;  %vm1838_vm12 = vcmask 24576  }
0x2da2   :  { %v1953_v25 = vld [vmem:[%s3103_s12] ss:$0 sm:$0xff]  ;;  %v1815_v54 = vunpack.c.l.s4 %v2600_v53  ;;  %s2601_s12 = smov [#allocation16]  }
0x2da3   :  { %v1818_v58 = vshrl.u32 %v1817_v55, 7  ;;  %s1846_s15 = sshll.u32 %s2601_s12, 4  ;;  %s1847_s15 = int_to_ptr.vmem [resolvable:$true] %s1846_s15 }
0x2da4   :  { %v1816_v56 = vunpack.c.0.s8 %v1815_v54  ;;  %s2550_s30 = scalar_lea.vmem %s1847_s15, 32  ;;  %p2555_p3 = scmp.lt.s32.totalorder %s1847_s15, %s1847_s15 }
0x2da5   :  { %p2551_p2 = scmp.ne.s32.totalorder %s1847_s15, %s2550_s30  ;;  %p2556_p4 = scmp.lt.s32.totalorder %s2550_s30, %s2550_s30 }
0x2da6   :  { %v1819_v59 = vsub.s32 %v1816_v56, %v1818_v58 }
0x2da7   :  { %p2557_p5 = por %p2556_p4, %p2555_p3 }
0x2da9   :  { %p2558_p6 = pnand %p2557_p5, %p2551_p2 }
0x2e53   :  { %v1801_v47 = vpop.f32.mrb[36].mxu1 }
0x2e54   :  { %v1802_v48 = vadd.f32 %v1953_v25, %v1801_v47  ;;  %v2173_v18 = vpop.f32.mrb[37].mxu1 }
0x2e55   :  { %v1804_v49 = vpop.f32.mrb[38].mxu1 }
0x2e56   :  { %v1957_v50 = vmul.f32 -1.442695, %v1802_v48  ;;  %v2174_v51 = vpop.f32.mrb[39].mxu1 }
0x2e58   :  { %2348 = vpow2.f32 %v1957_v50 }
0x2e62   :  { %v2349_v52 = vpop.eup %2348 }
0x2e63   :  { %v1810_v36 = vadd.f32 1.0, %v2349_v52 }
0x2e65   :  { %2350 = vrcp.f32 %v1810_v36 }
0x2e6f   :  { %v2351_v60 = vpop.eup %2350 }
0x2e70   :  { %v1820_v61 = vrot.slane %v2351_v60, %v1819_v59 }
0x2e72   :  { %v1821_v62 = vcombine.high %v1820_v61, %v1820_v61  ;;  %v1828_v63 = vrot.slane %v1820_v61, %v1819_v59 }
0x2e74   :  { %v1835_v1 = vrot.slane %v1821_v62, %v1819_v59  ;;  %1839 = vst.msk [vmem:[#allocation16] sm:$0x1] %vm1838_vm12, %v1828_v63 }
0x2e76   :  { %1840 = vst.msk [vmem:[#allocation16 + $0x1] sm:$0x1] %vm1838_vm12, %v1835_v1 }
0x2e77   :  { %2561 = shalt.err (!%p2558_p6)
}
0x2e78   :  { %s2562_s1 = scalar_lea.hbm %s3104_s13, 32 }
0x2e79   :  { %p2563_p7 = scmp.ne.s32.totalorder %s3104_s13, %s2562_s1  ;;  %p2566_p8 = scmp.lt.u32.totalorder %s2562_s1, %s3104_s13 }
0x2e7b   :  { %p2568_p9 = pnand %p2566_p8, %p2563_p7 }
0x2e7d   :  { %2571 = shalt.err (!%p2568_p9)
}
0x2e7e   :  { %s2602_s9 = smov 16   ;;  %s2603_s22 = smov 1  }
0x2e7f   :  { %1852 = dma.vmem_to_hbm [thread:$0]  %s1847_s15, 32, %s3104_s13, [#allocation6], %s2602_s9, %s2602_s9, %s2603_s22  }
0x2e80   :  { %2580 = dma.done.wait [#allocation6], 32  }
0x2e81   :  { %2581 = vsyncadd [#allocation6], 4294967264 }
0x2e82   :  { %2582 = dma.done.wait [#allocation18], 128  }
0x2e83   :  { %2583 = vsyncadd [#allocation18], 4294967168 }
0x2e84   :  { %1886 = vsyncpa [#allocation5], 1 }
0x2e85   :  { %1887 = vsyncpa [#allocation8], 1 }
0x2e86   :  { %1888 = vsyncpa [#allocation11], 1 }
0x2e87   :  { %1889 = vsyncpa [#allocation14], 1 }
0x2e88   :  { %1890 = vsyncpa [#allocation6], 1 }
0x2e89   :  { %1891 = vsyncpa [#allocation18], 1 }

</bundles_post_ra>
